<compile_context>
chip_gen: v7x
topology: tpu7x:2x2x1
jax: 0.10.0
libtpu: 0.0.40
codegen_flags: <defaults>
</compile_context>

<pallas_src>
import functools

import jax
import jax.numpy as jnp
from jax import lax
from jax.experimental import pallas as pl
from jax.experimental.pallas import tpu as pltpu


def _lstm_chunk_kernel(nvalid_ref, len_ref, xp_ref, whh_ref, we_ref, be_ref,
                       ctx_ref, h_out_ref, c_out_ref, h_sc, c_sc, *, tc, hp):
    """One grid step = one (batch_tile, time_chunk) of `tc` LSTM steps.

    Refs (per block):
      nvalid_ref : SMEM (1,) int32   number of time-chunks containing valid steps
      len_ref    : (Bb, 1)  int32    sequence lengths
      xp_ref     : (Bb, tc*4*hp)     pre-projected gates x_t@W_ih^T + b (lane-dense)
      whh_ref    : (hp, 4*hp) f32    recurrent weight W_hh^T (gate-padded)
      we_ref     : (hp, hp)   f32    encoder2decoder weight^T (padded)
      be_ref     : (1, hp)    f32    encoder2decoder bias (padded)
      ctx_ref    : (Bb, tc*hp)       output hidden states for this chunk
      h_out_ref  : (Bb, hp)   f32    encoder2decoder(h_final)
      c_out_ref  : (Bb, hp)   f32    encoder2decoder(c_final)
      h_sc, c_sc : (Bb, hp)   f32    recurrent carries (VMEM scratch)
    """
    chunk = pl.program_id(1)

    @pl.when(chunk == 0)
    def _():
        h_sc[...] = jnp.zeros_like(h_sc)
        c_sc[...] = jnp.zeros_like(c_sc)

    @pl.when(chunk < nvalid_ref[0])
    def _():
        lengths = len_ref[...]                   # (Bb, 1) int32
        t0 = chunk * tc
        w_hh = whh_ref[...]                      # hoisted: one load per chunk
        # Carries live in vregs across the unrolled steps (load once / store once).
        h = h_sc[...]
        c = c_sc[...]
        # Statically unrolled: every load/store/slice has a compile-time,
        # lane-aligned offset (hp is a multiple of 128).
        for s in range(tc):
            xg = xp_ref[:, s * 4 * hp:(s + 1) * 4 * hp].astype(jnp.float32)
            gates = xg + jnp.dot(h, w_hh, preferred_element_type=jnp.float32)

            i_g = jax.nn.sigmoid(gates[:, 0 * hp:1 * hp])
            f_g = jax.nn.sigmoid(gates[:, 1 * hp:2 * hp])
            g_g = jnp.tanh(gates[:, 2 * hp:3 * hp])
            o_g = jax.nn.sigmoid(gates[:, 3 * hp:4 * hp])

            c_new = f_g * c + i_g * g_g
            h_new = o_g * jnp.tanh(c_new)

            valid = (t0 + s) < lengths            # (Bb, 1) bool
            h = jnp.where(valid, h_new, h)
            c = jnp.where(valid, c_new, c)
            ctx_ref[:, s * hp:(s + 1) * hp] = jnp.where(
                valid, h_new, jnp.zeros_like(h_new)).astype(ctx_ref.dtype)
        h_sc[...] = h
        c_sc[...] = c

    @pl.when(chunk >= nvalid_ref[0])
    def _():
        # Chunk entirely beyond every sequence length: zero ctx, skip compute.
        ctx_ref[...] = jnp.zeros_like(ctx_ref)

    @pl.when(chunk == pl.num_programs(1) - 1)
    def _():
        # encoder2decoder linear on final hidden and cell states (f32).
        # (Relies on chunk being the inner grid axis so these output blocks
        #  are written back only after the last chunk of each batch tile.)
        we = we_ref[...]
        be = be_ref[...]
        h_out_ref[...] = jnp.dot(h_sc[...], we,
                                 preferred_element_type=jnp.float32) + be
        c_out_ref[...] = jnp.dot(c_sc[...], we,
                                 preferred_element_type=jnp.float32) + be


def _pad_gate_rows(w, hid, hp):
    """(4*hid, X) -> (4*hp, X): zero-pad each of the 4 gate blocks to hp rows."""
    x_dim = w.shape[1]
    w4 = w.reshape(4, hid, x_dim)
    return jnp.zeros((4, hp, x_dim), w.dtype).at[:, :hid, :].set(
        w4).reshape(4 * hp, x_dim)


def _pad_gate_vec(b, hid, hp):
    """(4*hid,) -> (4*hp,): zero-pad each gate block."""
    b4 = b.reshape(4, hid)
    return jnp.zeros((4, hp), b.dtype).at[:, :hid].set(b4).reshape(4 * hp)


@functools.partial(jax.jit,
                   static_argnames=("time_chunk", "batch_tiles",
                                    "compute_dtype", "ctx_dtype"))
def encoder_lstm_pallas(inputs, lengths, params, *, time_chunk=32,
                        batch_tiles=1, compute_dtype=jnp.bfloat16,
                        ctx_dtype=None):
    """inputs: (B, T) int32 token ids; lengths: (B,) int32.

    Returns (ctx (B, T, H), (h (1, B, H) f32, c (1, B, H) f32)).
    ctx positions at t >= lengths[b] are zero (pad_packed_sequence padding);
    PyTorch additionally truncates ctx to max(lengths) — do that at call site.
    ctx dtype defaults to compute_dtype (bf16) to halve the dominant HBM write
    stream; pass ctx_dtype=jnp.float32 for exact module semantics.
    """
    if ctx_dtype is None:
        ctx_dtype = compute_dtype
    cd = compute_dtype

    emb = params["embedding"]                       # (V, E)
    w_ih = params["w_ih"]                           # (4H, E)
    w_hh = params["w_hh"]                           # (4H, H)
    bias = params["b_ih"] + params["b_hh"]          # (4H,)
    B, T = inputs.shape
    E = emb.shape[1]
    H = w_hh.shape[1]
    HP = ((H + 127) // 128) * 128                   # lane-aligned hidden size
    Tc = time_chunk

    num_chunks = -(-T // Tc)
    T_pad = num_chunks * Tc
    if T_pad != T:
        inputs = jnp.pad(inputs, ((0, 0), (0, T_pad - T)))   # masked anyway

    assert B % batch_tiles == 0
    Bb = B // batch_tiles
    if batch_tiles > 1:
        # bf16 blocks need a 16-row sublane tile; f32 needs 8.
        sub = 8 if (jnp.dtype(cd).itemsize == 4
                    and jnp.dtype(ctx_dtype).itemsize == 4) else 16
        assert Bb % sub == 0, "batch tile must be a sublane-tile multiple"

    # ---- weight packing (gate-wise zero padding H -> HP keeps padded lanes 0)
    w_ih_pT = _pad_gate_rows(w_ih, H, HP).T                         # (E, 4HP)
    bias_p = _pad_gate_vec(bias, H, HP)[None, :].astype(jnp.float32)
    w_hh_p = jnp.pad(_pad_gate_rows(w_hh, H, HP), ((0, 0), (0, HP - H)))
    w_hh_t = w_hh_p.T.astype(jnp.float32)                           # (HP, 4HP)
    we_t = jnp.pad(params["w_e2d"],
                   ((0, HP - H), (0, HP - H))).T.astype(jnp.float32)  # (HP, HP)
    be = jnp.pad(params["b_e2d"], (0, HP - H))[None, :].astype(jnp.float32)

    # ---- embedding lookup + hoisted input projection (one big XLA matmul)
    x = jnp.take(emb, inputs, axis=0)                               # (B, Tp, E)
    # Dropout: identity in eval mode.  # TODO(synk): training-mode dropout.
    xp = jnp.dot(x.reshape(B * T_pad, E).astype(cd), w_ih_pT.astype(cd),
                 preferred_element_type=jnp.float32) + bias_p       # f32
    xp_flat = xp.reshape(B, T_pad * 4 * HP).astype(cd)              # lane-dense

    len_col = lengths.astype(jnp.int32)[:, None]                    # (B, 1)
    # Number of time-chunks containing at least one valid step (global; a
    # per-batch-tile count would skip more when batch_tiles > 1 — TODO(synk)).
    n_valid = jnp.minimum(
        (jnp.max(lengths).astype(jnp.int32) + Tc - 1) // Tc,
        num_chunks).reshape(1)

    kernel = functools.partial(_lstm_chunk_kernel, tc=Tc, hp=HP)

    ctx_flat, h_fin, c_fin = pl.pallas_call(
        kernel,
        out_shape=(
            jax.ShapeDtypeStruct((B, T_pad * HP), ctx_dtype),
            jax.ShapeDtypeStruct((B, HP), jnp.float32),
            jax.ShapeDtypeStruct((B, HP), jnp.float32),
        ),
        grid_spec=pltpu.PrefetchScalarGridSpec(
            num_scalar_prefetch=1,                     # n_valid -> SMEM
            grid=(batch_tiles, num_chunks),
            in_specs=[
                pl.BlockSpec((Bb, 1), lambda bt, c, nv: (bt, 0)),          # lens
                pl.BlockSpec((Bb, Tc * 4 * HP), lambda bt, c, nv: (bt, c)),  # xp
                pl.BlockSpec((HP, 4 * HP), lambda bt, c, nv: (0, 0)),      # W_hh^T
                pl.BlockSpec((HP, HP), lambda bt, c, nv: (0, 0)),          # W_e2d^T
                pl.BlockSpec((1, HP), lambda bt, c, nv: (0, 0)),           # b_e2d
            ],
            out_specs=[
                pl.BlockSpec((Bb, Tc * HP), lambda bt, c, nv: (bt, c)),    # ctx
                pl.BlockSpec((Bb, HP), lambda bt, c, nv: (bt, 0)),         # h out
                pl.BlockSpec((Bb, HP), lambda bt, c, nv: (bt, 0)),         # c out
            ],
            scratch_shapes=[
                pltpu.VMEM((Bb, HP), jnp.float32),                         # h carry
                pltpu.VMEM((Bb, HP), jnp.float32),                         # c carry
            ],
        ),
        compiler_params=pltpu.CompilerParams(
            # batch-tile axis parallel (v7x megacore), time axis arbitrary
            dimension_semantics=("parallel", "arbitrary"),
            vmem_limit_bytes=48 * 1024 * 1024,
        ),
    )(n_valid, len_col, xp_flat, w_hh_t, we_t, be)

    ctx = ctx_flat.reshape(B, T_pad, HP)[:, :T, :H]
    state = (h_fin[:, :H][None], c_fin[:, :H][None])   # (1, B, H) each
    return ctx, state


def _reference_jax(inputs, lengths, params):
    """Pure-JAX f32 reference (masked LSTM == packed-sequence semantics)."""
    emb = params["embedding"]
    w_ih, w_hh = params["w_ih"], params["w_hh"]
    b = params["b_ih"] + params["b_hh"]
    we, be = params["w_e2d"], params["b_e2d"]
    x = jnp.take(emb, inputs, axis=0)                         # (B, T, E)
    B, T, _ = x.shape
    H = w_hh.shape[1]

    def step(carry, t):
        h, c = carry
        gates = x[:, t, :] @ w_ih.T + h @ w_hh.T + b
        i = jax.nn.sigmoid(gates[:, 0 * H:1 * H])
        f = jax.nn.sigmoid(gates[:, 1 * H:2 * H])
        g = jnp.tanh(gates[:, 2 * H:3 * H])
        o = jax.nn.sigmoid(gates[:, 3 * H:4 * H])
        c_new = f * c + i * g
        h_new = o * jnp.tanh(c_new)
        m = (t < lengths)[:, None].astype(jnp.float32)
        return (m * h_new + (1 - m) * h, m * c_new + (1 - m) * c), m * h_new

    (h, c), ctx = lax.scan(step, (jnp.zeros((B, H)), jnp.zeros((B, H))),
                           jnp.arange(T))
    ctx = jnp.transpose(ctx, (1, 0, 2))
    return ctx, ((h @ we.T + be)[None], (c @ we.T + be)[None])


def _init_params(key, vocab_size, embedding_size, hidden_size, padding_idx):
    ks = jax.random.split(key, 7)
    s = 0.1
    emb = s * jax.random.normal(ks[0], (vocab_size, embedding_size),
                                jnp.float32)
    emb = emb.at[padding_idx].set(0.0)
    return {
        "embedding": emb,
        "w_ih": s * jax.random.normal(ks[1], (4 * hidden_size,
                                              embedding_size), jnp.float32),
        "w_hh": s * jax.random.normal(ks[2], (4 * hidden_size,
                                              hidden_size), jnp.float32),
        "b_ih": s * jax.random.normal(ks[3], (4 * hidden_size,), jnp.float32),
        "b_hh": s * jax.random.normal(ks[4], (4 * hidden_size,), jnp.float32),
        "w_e2d": s * jax.random.normal(ks[5], (hidden_size, hidden_size),
                                       jnp.float32),
        "b_e2d": s * jax.random.normal(ks[6], (hidden_size,), jnp.float32),
    }


if __name__ == "__main__":
    VOCAB, E, H, PAD = 100, 32, 32, 0
    B, T, TC = 8, 24, 8            # 3 time-chunks; last one is fully dead

    key = jax.random.PRNGKey(0)
    k_par, k_tok = jax.random.split(key)
    params = _init_params(k_par, VOCAB, E, H, PAD)

    inputs = jax.random.randint(k_tok, (B, T), 1, VOCAB, dtype=jnp.int32)
    lengths = jnp.array([14, 11, 5, 9, 13, 2, 7, 10], dtype=jnp.int32)
    tmask = jnp.arange(T)[None, :] < lengths[:, None]
    inputs = jnp.where(tmask, inputs, PAD)

    ctx_ref, (h_ref, c_ref) = _reference_jax(inputs, lengths, params)
    max_len = int(jax.device_get(lengths).max())

    # f32 run: tight check of kernel semantics; bf16 run: production precision.
    for dtype, atol in ((jnp.float32, 1e-3), (jnp.bfloat16, 3e-2)):
        ctx, (h_st, c_st) = encoder_lstm_pallas(
            inputs, lengths, params, time_chunk=TC, batch_tiles=1,
            compute_dtype=dtype)
        jax.block_until_ready((ctx, h_st, c_st))
        ctx_f = ctx.astype(jnp.float32)

        # PyTorch's pad_packed_sequence truncates ctx to max(lengths).
        assert jnp.allclose(ctx_f[:, :max_len], ctx_ref[:, :max_len],
                            atol=atol), f"ctx mismatch ({jnp.dtype(dtype).name})"
        assert jnp.allclose(ctx_f[:, max_len:], 0.0), "ctx tail not zero"
        assert jnp.allclose(h_st, h_ref, atol=atol), \
            f"h state mismatch ({jnp.dtype(dtype).name})"
        assert jnp.allclose(c_st, c_ref, atol=atol), \
            f"c state mismatch ({jnp.dtype(dtype).name})"

    print("KERNEL_OK")
</pallas_src>

<mosaic_0001>
module attributes {stable_mosaic.version = 11 : i64} {
  func.func @_lstm_chunk_kernel(%arg0: i32, %arg1: i32, %arg2: memref<1xi32, #tpu.memory_space<smem>>, %arg3: memref<8x1xi32, #tpu.memory_space<vmem>>, %arg4: memref<8x4096xf32, #tpu.memory_space<vmem>>, %arg5: memref<128x512xf32, #tpu.memory_space<vmem>>, %arg6: memref<128x128xf32, #tpu.memory_space<vmem>>, %arg7: memref<1x128xf32, #tpu.memory_space<vmem>>, %arg8: memref<8x1024xf32, #tpu.memory_space<vmem>>, %arg9: memref<8x128xf32, #tpu.memory_space<vmem>>, %arg10: memref<8x128xf32, #tpu.memory_space<vmem>>, %arg11: memref<8x128xf32, #tpu.memory_space<vmem>>, %arg12: memref<8x128xf32, #tpu.memory_space<vmem>>) attributes {dimension_semantics = [#tpu.dimension_semantics<parallel>, #tpu.dimension_semantics<arbitrary>], iteration_bounds = array<i64: 1, 3>, scalar_prefetch = 1 : i64, scratch_operands = 2 : i64, tpu.core_type = #tpu.core_type<tc>, window_params = [{transform_indices = @transform_0, window_bounds = array<i64: 8, 1>}, {transform_indices = @transform_1, window_bounds = array<i64: 8, 4096>}, {pipeline_mode = #tpu.pipeline_mode<synchronous>, transform_indices = @transform_2, window_bounds = array<i64: 128, 512>}, {pipeline_mode = #tpu.pipeline_mode<synchronous>, transform_indices = @transform_3, window_bounds = array<i64: 128, 128>}, {pipeline_mode = #tpu.pipeline_mode<synchronous>, transform_indices = @transform_4, window_bounds = array<i64: 1, 128>}, {transform_indices = @transform_5, window_bounds = array<i64: 8, 1024>}, {transform_indices = @transform_6, window_bounds = array<i64: 8, 128>}, {transform_indices = @transform_7, window_bounds = array<i64: 8, 128>}]} {
    %c0_i32 = arith.constant 0 : i32
    %0 = arith.cmpi eq, %arg1, %c0_i32 : i32
    %1 = arith.extui %0 : i1 to i32
    %c0_i32_0 = arith.constant 0 : i32
    %2 = arith.cmpi ne, %1, %c0_i32_0 : i32
    scf.if %2 {
      %cst = arith.constant 0.000000e+00 : f32
      %14 = vector.broadcast %cst : f32 to vector<8x128xf32>
      %c0_5 = arith.constant 0 : index
      %c0_6 = arith.constant 0 : index
      %15 = vector.load %arg11[%c0_5, %c0_6] : memref<8x128xf32, #tpu.memory_space<vmem>>, vector<8x128xf32>
      tpu.vector_store %arg11[%c0_5, %c0_6], %14 {strides = array<i32>} : memref<8x128xf32, #tpu.memory_space<vmem>>, vector<8x128xf32>,
      %cst_7 = arith.constant 0.000000e+00 : f32
      %16 = vector.broadcast %cst_7 : f32 to vector<8x128xf32>
      %c0_8 = arith.constant 0 : index
      %c0_9 = arith.constant 0 : index
      %17 = vector.load %arg12[%c0_8, %c0_9] : memref<8x128xf32, #tpu.memory_space<vmem>>, vector<8x128xf32>
      tpu.vector_store %arg12[%c0_8, %c0_9], %16 {strides = array<i32>} : memref<8x128xf32, #tpu.memory_space<vmem>>, vector<8x128xf32>,
    } else {
    }
    %c0 = arith.constant 0 : index
    %3 = memref.load %arg2[%c0] : memref<1xi32, #tpu.memory_space<smem>>
    %4 = arith.cmpi slt, %arg1, %3 : i32
    %5 = arith.extui %4 : i1 to i32
    %c0_i32_1 = arith.constant 0 : i32
    %6 = arith.cmpi ne, %5, %c0_i32_1 : i32
    scf.if %6 {
      %c0_5 = arith.constant 0 : index
      %c0_6 = arith.constant 0 : index
      %14 = vector.load %arg3[%c0_5, %c0_6] : memref<8x1xi32, #tpu.memory_space<vmem>>, vector<8x1xi32>
      %c8_i32 = arith.constant 8 : i32
      %15 = arith.muli %arg1, %c8_i32 : i32
      %c0_7 = arith.constant 0 : index
      %c0_8 = arith.constant 0 : index
      %16 = vector.load %arg5[%c0_7, %c0_8] : memref<128x512xf32, #tpu.memory_space<vmem>>, vector<128x512xf32>
      %c0_9 = arith.constant 0 : index
      %c0_10 = arith.constant 0 : index
      %17 = vector.load %arg11[%c0_9, %c0_10] : memref<8x128xf32, #tpu.memory_space<vmem>>, vector<8x128xf32>
      %c0_11 = arith.constant 0 : index
      %c0_12 = arith.constant 0 : index
      %18 = vector.load %arg12[%c0_11, %c0_12] : memref<8x128xf32, #tpu.memory_space<vmem>>, vector<8x128xf32>
      %c0_13 = arith.constant 0 : index
      %c0_14 = arith.constant 0 : index
      %19 = vector.load %arg4[%c0_13, %c0_14] : memref<8x4096xf32, #tpu.memory_space<vmem>>, vector<8x512xf32>
      %cst = arith.constant dense<0.000000e+00> : vector<8x512xf32>
      %20 = tpu.matmul %17, %16, %cst {dimension_numbers = #tpu.dot_dimension_numbers<[1], [0], [0], [1], [0, 0, 1, 1], [], []>} : vector<8x128xf32>, vector<128x512xf32>, vector<8x512xf32> -> vector<8x512xf32>
      %21 = arith.addf %19, %20 : vector<8x512xf32>
      %22 = vector.extract_strided_slice %21 {offsets = [0, 0], sizes = [8, 128], strides = [1, 1]} : vector<8x512xf32> to vector<8x128xf32>
      %23 = arith.negf %22 : vector<8x128xf32>
      %24 = math.exp %23 : vector<8x128xf32>
      %cst_15 = arith.constant 1.000000e+00 : f32
      %25 = vector.broadcast %cst_15 : f32 to vector<8x128xf32>
      %26 = arith.addf %25, %24 : vector<8x128xf32>
      %27 = arith.divf %25, %26 : vector<8x128xf32>
      %28 = vector.extract_strided_slice %21 {offsets = [0, 128], sizes = [8, 128], strides = [1, 1]} : vector<8x512xf32> to vector<8x128xf32>
      %29 = arith.negf %28 : vector<8x128xf32>
      %30 = math.exp %29 : vector<8x128xf32>
      %cst_16 = arith.constant 1.000000e+00 : f32
      %31 = vector.broadcast %cst_16 : f32 to vector<8x128xf32>
      %32 = arith.addf %31, %30 : vector<8x128xf32>
      %33 = arith.divf %31, %32 : vector<8x128xf32>
      %34 = vector.extract_strided_slice %21 {offsets = [0, 256], sizes = [8, 128], strides = [1, 1]} : vector<8x512xf32> to vector<8x128xf32>
      %35 = math.tanh %34 : vector<8x128xf32>
      %36 = vector.extract_strided_slice %21 {offsets = [0, 384], sizes = [8, 128], strides = [1, 1]} : vector<8x512xf32> to vector<8x128xf32>
      %37 = arith.negf %36 : vector<8x128xf32>
      %38 = math.exp %37 : vector<8x128xf32>
      %cst_17 = arith.constant 1.000000e+00 : f32
      %39 = vector.broadcast %cst_17 : f32 to vector<8x128xf32>
      %40 = arith.addf %39, %38 : vector<8x128xf32>
      %41 = arith.divf %39, %40 : vector<8x128xf32>
      %42 = arith.mulf %33, %18 : vector<8x128xf32>
      %43 = arith.mulf %27, %35 : vector<8x128xf32>
      %44 = arith.addf %42, %43 : vector<8x128xf32>
      %45 = math.tanh %44 : vector<8x128xf32>
      %46 = arith.mulf %41, %45 : vector<8x128xf32>
      %c0_i32_18 = arith.constant 0 : i32
      %47 = arith.addi %15, %c0_i32_18 : i32
      %48 = vector.broadcast %47 : i32 to vector<8x1xi32>
      %49 = arith.cmpi slt, %48, %14 : vector<8x1xi32>
      %50 = vector.shape_cast %49 : vector<8x1xi1> to vector<8x1xi1>
      %51 = vector.broadcast %50 : vector<8x1xi1> to vector<8x128xi1>
      %52 = arith.select %51, %46, %17 : vector<8x128xi1>, vector<8x128xf32>
      %53 = vector.shape_cast %49 : vector<8x1xi1> to vector<8x1xi1>
      %54 = vector.broadcast %53 : vector<8x1xi1> to vector<8x128xi1>
      %55 = arith.select %54, %44, %18 : vector<8x128xi1>, vector<8x128xf32>
      %cst_19 = arith.constant 0.000000e+00 : f32
      %56 = vector.broadcast %cst_19 : f32 to vector<8x128xf32>
      %57 = vector.shape_cast %49 : vector<8x1xi1> to vector<8x1xi1>
      %58 = vector.broadcast %57 : vector<8x1xi1> to vector<8x128xi1>
      %59 = arith.select %58, %46, %56 : vector<8x128xi1>, vector<8x128xf32>
      %c0_20 = arith.constant 0 : index
      %c0_21 = arith.constant 0 : index
      %60 = vector.load %arg8[%c0_20, %c0_21] : memref<8x1024xf32, #tpu.memory_space<vmem>>, vector<8x128xf32>
      tpu.vector_store %arg8[%c0_20, %c0_21], %59 {strides = array<i32>} : memref<8x1024xf32, #tpu.memory_space<vmem>>, vector<8x128xf32>,
      %c0_22 = arith.constant 0 : index
      %c512 = arith.constant 512 : index
      %61 = vector.load %arg4[%c0_22, %c512] : memref<8x4096xf32, #tpu.memory_space<vmem>>, vector<8x512xf32>
      %cst_23 = arith.constant dense<0.000000e+00> : vector<8x512xf32>
      %62 = tpu.matmul %52, %16, %cst_23 {dimension_numbers = #tpu.dot_dimension_numbers<[1], [0], [0], [1], [0, 0, 1, 1], [], []>} : vector<8x128xf32>, vector<128x512xf32>, vector<8x512xf32> -> vector<8x512xf32>
      %63 = arith.addf %61, %62 : vector<8x512xf32>
      %64 = vector.extract_strided_slice %63 {offsets = [0, 0], sizes = [8, 128], strides = [1, 1]} : vector<8x512xf32> to vector<8x128xf32>
      %65 = arith.negf %64 : vector<8x128xf32>
      %66 = math.exp %65 : vector<8x128xf32>
      %cst_24 = arith.constant 1.000000e+00 : f32
      %67 = vector.broadcast %cst_24 : f32 to vector<8x128xf32>
      %68 = arith.addf %67, %66 : vector<8x128xf32>
      %69 = arith.divf %67, %68 : vector<8x128xf32>
      %70 = vector.extract_strided_slice %63 {offsets = [0, 128], sizes = [8, 128], strides = [1, 1]} : vector<8x512xf32> to vector<8x128xf32>
      %71 = arith.negf %70 : vector<8x128xf32>
      %72 = math.exp %71 : vector<8x128xf32>
      %cst_25 = arith.constant 1.000000e+00 : f32
      %73 = vector.broadcast %cst_25 : f32 to vector<8x128xf32>
      %74 = arith.addf %73, %72 : vector<8x128xf32>
      %75 = arith.divf %73, %74 : vector<8x128xf32>
      %76 = vector.extract_strided_slice %63 {offsets = [0, 256], sizes = [8, 128], strides = [1, 1]} : vector<8x512xf32> to vector<8x128xf32>
      %77 = math.tanh %76 : vector<8x128xf32>
      %78 = vector.extract_strided_slice %63 {offsets = [0, 384], sizes = [8, 128], strides = [1, 1]} : vector<8x512xf32> to vector<8x128xf32>
      %79 = arith.negf %78 : vector<8x128xf32>
      %80 = math.exp %79 : vector<8x128xf32>
      %cst_26 = arith.constant 1.000000e+00 : f32
      %81 = vector.broadcast %cst_26 : f32 to vector<8x128xf32>
      %82 = arith.addf %81, %80 : vector<8x128xf32>
      %83 = arith.divf %81, %82 : vector<8x128xf32>
      %84 = arith.mulf %75, %55 : vector<8x128xf32>
      %85 = arith.mulf %69, %77 : vector<8x128xf32>
      %86 = arith.addf %84, %85 : vector<8x128xf32>
      %87 = math.tanh %86 : vector<8x128xf32>
      %88 = arith.mulf %83, %87 : vector<8x128xf32>
      %c1_i32 = arith.constant 1 : i32
      %89 = arith.addi %15, %c1_i32 : i32
      %90 = vector.broadcast %89 : i32 to vector<8x1xi32>
      %91 = arith.cmpi slt, %90, %14 : vector<8x1xi32>
      %92 = vector.shape_cast %91 : vector<8x1xi1> to vector<8x1xi1>
      %93 = vector.broadcast %92 : vector<8x1xi1> to vector<8x128xi1>
      %94 = arith.select %93, %88, %52 : vector<8x128xi1>, vector<8x128xf32>
      %95 = vector.shape_cast %91 : vector<8x1xi1> to vector<8x1xi1>
      %96 = vector.broadcast %95 : vector<8x1xi1> to vector<8x128xi1>
      %97 = arith.select %96, %86, %55 : vector<8x128xi1>, vector<8x128xf32>
      %cst_27 = arith.constant 0.000000e+00 : f32
      %98 = vector.broadcast %cst_27 : f32 to vector<8x128xf32>
      %99 = vector.shape_cast %91 : vector<8x1xi1> to vector<8x1xi1>
      %100 = vector.broadcast %99 : vector<8x1xi1> to vector<8x128xi1>
      %101 = arith.select %100, %88, %98 : vector<8x128xi1>, vector<8x128xf32>
      %c0_28 = arith.constant 0 : index
      %c128 = arith.constant 128 : index
      %102 = vector.load %arg8[%c0_28, %c128] : memref<8x1024xf32, #tpu.memory_space<vmem>>, vector<8x128xf32>
      tpu.vector_store %arg8[%c0_28, %c128], %101 {strides = array<i32>} : memref<8x1024xf32, #tpu.memory_space<vmem>>, vector<8x128xf32>,
      %c0_29 = arith.constant 0 : index
      %c1024 = arith.constant 1024 : index
      %103 = vector.load %arg4[%c0_29, %c1024] : memref<8x4096xf32, #tpu.memory_space<vmem>>, vector<8x512xf32>
      %cst_30 = arith.constant dense<0.000000e+00> : vector<8x512xf32>
      %104 = tpu.matmul %94, %16, %cst_30 {dimension_numbers = #tpu.dot_dimension_numbers<[1], [0], [0], [1], [0, 0, 1, 1], [], []>} : vector<8x128xf32>, vector<128x512xf32>, vector<8x512xf32> -> vector<8x512xf32>
      %105 = arith.addf %103, %104 : vector<8x512xf32>
      %106 = vector.extract_strided_slice %105 {offsets = [0, 0], sizes = [8, 128], strides = [1, 1]} : vector<8x512xf32> to vector<8x128xf32>
      %107 = arith.negf %106 : vector<8x128xf32>
      %108 = math.exp %107 : vector<8x128xf32>
      %cst_31 = arith.constant 1.000000e+00 : f32
      %109 = vector.broadcast %cst_31 : f32 to vector<8x128xf32>
      %110 = arith.addf %109, %108 : vector<8x128xf32>
      %111 = arith.divf %109, %110 : vector<8x128xf32>
      %112 = vector.extract_strided_slice %105 {offsets = [0, 128], sizes = [8, 128], strides = [1, 1]} : vector<8x512xf32> to vector<8x128xf32>
      %113 = arith.negf %112 : vector<8x128xf32>
      %114 = math.exp %113 : vector<8x128xf32>
      %cst_32 = arith.constant 1.000000e+00 : f32
      %115 = vector.broadcast %cst_32 : f32 to vector<8x128xf32>
      %116 = arith.addf %115, %114 : vector<8x128xf32>
      %117 = arith.divf %115, %116 : vector<8x128xf32>
      %118 = vector.extract_strided_slice %105 {offsets = [0, 256], sizes = [8, 128], strides = [1, 1]} : vector<8x512xf32> to vector<8x128xf32>
      %119 = math.tanh %118 : vector<8x128xf32>
      %120 = vector.extract_strided_slice %105 {offsets = [0, 384], sizes = [8, 128], strides = [1, 1]} : vector<8x512xf32> to vector<8x128xf32>
      %121 = arith.negf %120 : vector<8x128xf32>
      %122 = math.exp %121 : vector<8x128xf32>
      %cst_33 = arith.constant 1.000000e+00 : f32
      %123 = vector.broadcast %cst_33 : f32 to vector<8x128xf32>
      %124 = arith.addf %123, %122 : vector<8x128xf32>
      %125 = arith.divf %123, %124 : vector<8x128xf32>
      %126 = arith.mulf %117, %97 : vector<8x128xf32>
      %127 = arith.mulf %111, %119 : vector<8x128xf32>
      %128 = arith.addf %126, %127 : vector<8x128xf32>
      %129 = math.tanh %128 : vector<8x128xf32>
      %130 = arith.mulf %125, %129 : vector<8x128xf32>
      %c2_i32_34 = arith.constant 2 : i32
      %131 = arith.addi %15, %c2_i32_34 : i32
      %132 = vector.broadcast %131 : i32 to vector<8x1xi32>
      %133 = arith.cmpi slt, %132, %14 : vector<8x1xi32>
      %134 = vector.shape_cast %133 : vector<8x1xi1> to vector<8x1xi1>
      %135 = vector.broadcast %134 : vector<8x1xi1> to vector<8x128xi1>
      %136 = arith.select %135, %130, %94 : vector<8x128xi1>, vector<8x128xf32>
      %137 = vector.shape_cast %133 : vector<8x1xi1> to vector<8x1xi1>
      %138 = vector.broadcast %137 : vector<8x1xi1> to vector<8x128xi1>
      %139 = arith.select %138, %128, %97 : vector<8x128xi1>, vector<8x128xf32>
      %cst_35 = arith.constant 0.000000e+00 : f32
      %140 = vector.broadcast %cst_35 : f32 to vector<8x128xf32>
      %141 = vector.shape_cast %133 : vector<8x1xi1> to vector<8x1xi1>
      %142 = vector.broadcast %141 : vector<8x1xi1> to vector<8x128xi1>
      %143 = arith.select %142, %130, %140 : vector<8x128xi1>, vector<8x128xf32>
      %c0_36 = arith.constant 0 : index
      %c256 = arith.constant 256 : index
      %144 = vector.load %arg8[%c0_36, %c256] : memref<8x1024xf32, #tpu.memory_space<vmem>>, vector<8x128xf32>
      tpu.vector_store %arg8[%c0_36, %c256], %143 {strides = array<i32>} : memref<8x1024xf32, #tpu.memory_space<vmem>>, vector<8x128xf32>,
      %c0_37 = arith.constant 0 : index
      %c1536 = arith.constant 1536 : index
      %145 = vector.load %arg4[%c0_37, %c1536] : memref<8x4096xf32, #tpu.memory_space<vmem>>, vector<8x512xf32>
      %cst_38 = arith.constant dense<0.000000e+00> : vector<8x512xf32>
      %146 = tpu.matmul %136, %16, %cst_38 {dimension_numbers = #tpu.dot_dimension_numbers<[1], [0], [0], [1], [0, 0, 1, 1], [], []>} : vector<8x128xf32>, vector<128x512xf32>, vector<8x512xf32> -> vector<8x512xf32>
      %147 = arith.addf %145, %146 : vector<8x512xf32>
      %148 = vector.extract_strided_slice %147 {offsets = [0, 0], sizes = [8, 128], strides = [1, 1]} : vector<8x512xf32> to vector<8x128xf32>
      %149 = arith.negf %148 : vector<8x128xf32>
      %150 = math.exp %149 : vector<8x128xf32>
      %cst_39 = arith.constant 1.000000e+00 : f32
      %151 = vector.broadcast %cst_39 : f32 to vector<8x128xf32>
      %152 = arith.addf %151, %150 : vector<8x128xf32>
      %153 = arith.divf %151, %152 : vector<8x128xf32>
      %154 = vector.extract_strided_slice %147 {offsets = [0, 128], sizes = [8, 128], strides = [1, 1]} : vector<8x512xf32> to vector<8x128xf32>
      %155 = arith.negf %154 : vector<8x128xf32>
      %156 = math.exp %155 : vector<8x128xf32>
      %cst_40 = arith.constant 1.000000e+00 : f32
      %157 = vector.broadcast %cst_40 : f32 to vector<8x128xf32>
      %158 = arith.addf %157, %156 : vector<8x128xf32>
      %159 = arith.divf %157, %158 : vector<8x128xf32>
      %160 = vector.extract_strided_slice %147 {offsets = [0, 256], sizes = [8, 128], strides = [1, 1]} : vector<8x512xf32> to vector<8x128xf32>
      %161 = math.tanh %160 : vector<8x128xf32>
      %162 = vector.extract_strided_slice %147 {offsets = [0, 384], sizes = [8, 128], strides = [1, 1]} : vector<8x512xf32> to vector<8x128xf32>
      %163 = arith.negf %162 : vector<8x128xf32>
      %164 = math.exp %163 : vector<8x128xf32>
      %cst_41 = arith.constant 1.000000e+00 : f32
      %165 = vector.broadcast %cst_41 : f32 to vector<8x128xf32>
      %166 = arith.addf %165, %164 : vector<8x128xf32>
      %167 = arith.divf %165, %166 : vector<8x128xf32>
      %168 = arith.mulf %159, %139 : vector<8x128xf32>
      %169 = arith.mulf %153, %161 : vector<8x128xf32>
      %170 = arith.addf %168, %169 : vector<8x128xf32>
      %171 = math.tanh %170 : vector<8x128xf32>
      %172 = arith.mulf %167, %171 : vector<8x128xf32>
      %c3_i32 = arith.constant 3 : i32
      %173 = arith.addi %15, %c3_i32 : i32
      %174 = vector.broadcast %173 : i32 to vector<8x1xi32>
      %175 = arith.cmpi slt, %174, %14 : vector<8x1xi32>
      %176 = vector.shape_cast %175 : vector<8x1xi1> to vector<8x1xi1>
      %177 = vector.broadcast %176 : vector<8x1xi1> to vector<8x128xi1>
      %178 = arith.select %177, %172, %136 : vector<8x128xi1>, vector<8x128xf32>
      %179 = vector.shape_cast %175 : vector<8x1xi1> to vector<8x1xi1>
      %180 = vector.broadcast %179 : vector<8x1xi1> to vector<8x128xi1>
      %181 = arith.select %180, %170, %139 : vector<8x128xi1>, vector<8x128xf32>
      %cst_42 = arith.constant 0.000000e+00 : f32
      %182 = vector.broadcast %cst_42 : f32 to vector<8x128xf32>
      %183 = vector.shape_cast %175 : vector<8x1xi1> to vector<8x1xi1>
      %184 = vector.broadcast %183 : vector<8x1xi1> to vector<8x128xi1>
      %185 = arith.select %184, %172, %182 : vector<8x128xi1>, vector<8x128xf32>
      %c0_43 = arith.constant 0 : index
      %c384 = arith.constant 384 : index
      %186 = vector.load %arg8[%c0_43, %c384] : memref<8x1024xf32, #tpu.memory_space<vmem>>, vector<8x128xf32>
      tpu.vector_store %arg8[%c0_43, %c384], %185 {strides = array<i32>} : memref<8x1024xf32, #tpu.memory_space<vmem>>, vector<8x128xf32>,
      %c0_44 = arith.constant 0 : index
      %c2048 = arith.constant 2048 : index
      %187 = vector.load %arg4[%c0_44, %c2048] : memref<8x4096xf32, #tpu.memory_space<vmem>>, vector<8x512xf32>
      %cst_45 = arith.constant dense<0.000000e+00> : vector<8x512xf32>
      %188 = tpu.matmul %178, %16, %cst_45 {dimension_numbers = #tpu.dot_dimension_numbers<[1], [0], [0], [1], [0, 0, 1, 1], [], []>} : vector<8x128xf32>, vector<128x512xf32>, vector<8x512xf32> -> vector<8x512xf32>
      %189 = arith.addf %187, %188 : vector<8x512xf32>
      %190 = vector.extract_strided_slice %189 {offsets = [0, 0], sizes = [8, 128], strides = [1, 1]} : vector<8x512xf32> to vector<8x128xf32>
      %191 = arith.negf %190 : vector<8x128xf32>
      %192 = math.exp %191 : vector<8x128xf32>
      %cst_46 = arith.constant 1.000000e+00 : f32
      %193 = vector.broadcast %cst_46 : f32 to vector<8x128xf32>
      %194 = arith.addf %193, %192 : vector<8x128xf32>
      %195 = arith.divf %193, %194 : vector<8x128xf32>
      %196 = vector.extract_strided_slice %189 {offsets = [0, 128], sizes = [8, 128], strides = [1, 1]} : vector<8x512xf32> to vector<8x128xf32>
      %197 = arith.negf %196 : vector<8x128xf32>
      %198 = math.exp %197 : vector<8x128xf32>
      %cst_47 = arith.constant 1.000000e+00 : f32
      %199 = vector.broadcast %cst_47 : f32 to vector<8x128xf32>
      %200 = arith.addf %199, %198 : vector<8x128xf32>
      %201 = arith.divf %199, %200 : vector<8x128xf32>
      %202 = vector.extract_strided_slice %189 {offsets = [0, 256], sizes = [8, 128], strides = [1, 1]} : vector<8x512xf32> to vector<8x128xf32>
      %203 = math.tanh %202 : vector<8x128xf32>
      %204 = vector.extract_strided_slice %189 {offsets = [0, 384], sizes = [8, 128], strides = [1, 1]} : vector<8x512xf32> to vector<8x128xf32>
      %205 = arith.negf %204 : vector<8x128xf32>
      %206 = math.exp %205 : vector<8x128xf32>
      %cst_48 = arith.constant 1.000000e+00 : f32
      %207 = vector.broadcast %cst_48 : f32 to vector<8x128xf32>
      %208 = arith.addf %207, %206 : vector<8x128xf32>
      %209 = arith.divf %207, %208 : vector<8x128xf32>
      %210 = arith.mulf %201, %181 : vector<8x128xf32>
      %211 = arith.mulf %195, %203 : vector<8x128xf32>
      %212 = arith.addf %210, %211 : vector<8x128xf32>
      %213 = math.tanh %212 : vector<8x128xf32>
      %214 = arith.mulf %209, %213 : vector<8x128xf32>
      %c4_i32 = arith.constant 4 : i32
      %215 = arith.addi %15, %c4_i32 : i32
      %216 = vector.broadcast %215 : i32 to vector<8x1xi32>
      %217 = arith.cmpi slt, %216, %14 : vector<8x1xi32>
      %218 = vector.shape_cast %217 : vector<8x1xi1> to vector<8x1xi1>
      %219 = vector.broadcast %218 : vector<8x1xi1> to vector<8x128xi1>
      %220 = arith.select %219, %214, %178 : vector<8x128xi1>, vector<8x128xf32>
      %221 = vector.shape_cast %217 : vector<8x1xi1> to vector<8x1xi1>
      %222 = vector.broadcast %221 : vector<8x1xi1> to vector<8x128xi1>
      %223 = arith.select %222, %212, %181 : vector<8x128xi1>, vector<8x128xf32>
      %cst_49 = arith.constant 0.000000e+00 : f32
      %224 = vector.broadcast %cst_49 : f32 to vector<8x128xf32>
      %225 = vector.shape_cast %217 : vector<8x1xi1> to vector<8x1xi1>
      %226 = vector.broadcast %225 : vector<8x1xi1> to vector<8x128xi1>
      %227 = arith.select %226, %214, %224 : vector<8x128xi1>, vector<8x128xf32>
      %c0_50 = arith.constant 0 : index
      %c512_51 = arith.constant 512 : index
      %228 = vector.load %arg8[%c0_50, %c512_51] : memref<8x1024xf32, #tpu.memory_space<vmem>>, vector<8x128xf32>
      tpu.vector_store %arg8[%c0_50, %c512_51], %227 {strides = array<i32>} : memref<8x1024xf32, #tpu.memory_space<vmem>>, vector<8x128xf32>,
      %c0_52 = arith.constant 0 : index
      %c2560 = arith.constant 2560 : index
      %229 = vector.load %arg4[%c0_52, %c2560] : memref<8x4096xf32, #tpu.memory_space<vmem>>, vector<8x512xf32>
      %cst_53 = arith.constant dense<0.000000e+00> : vector<8x512xf32>
      %230 = tpu.matmul %220, %16, %cst_53 {dimension_numbers = #tpu.dot_dimension_numbers<[1], [0], [0], [1], [0, 0, 1, 1], [], []>} : vector<8x128xf32>, vector<128x512xf32>, vector<8x512xf32> -> vector<8x512xf32>
      %231 = arith.addf %229, %230 : vector<8x512xf32>
      %232 = vector.extract_strided_slice %231 {offsets = [0, 0], sizes = [8, 128], strides = [1, 1]} : vector<8x512xf32> to vector<8x128xf32>
      %233 = arith.negf %232 : vector<8x128xf32>
      %234 = math.exp %233 : vector<8x128xf32>
      %cst_54 = arith.constant 1.000000e+00 : f32
      %235 = vector.broadcast %cst_54 : f32 to vector<8x128xf32>
      %236 = arith.addf %235, %234 : vector<8x128xf32>
      %237 = arith.divf %235, %236 : vector<8x128xf32>
      %238 = vector.extract_strided_slice %231 {offsets = [0, 128], sizes = [8, 128], strides = [1, 1]} : vector<8x512xf32> to vector<8x128xf32>
      %239 = arith.negf %238 : vector<8x128xf32>
      %240 = math.exp %239 : vector<8x128xf32>
      %cst_55 = arith.constant 1.000000e+00 : f32
      %241 = vector.broadcast %cst_55 : f32 to vector<8x128xf32>
      %242 = arith.addf %241, %240 : vector<8x128xf32>
      %243 = arith.divf %241, %242 : vector<8x128xf32>
      %244 = vector.extract_strided_slice %231 {offsets = [0, 256], sizes = [8, 128], strides = [1, 1]} : vector<8x512xf32> to vector<8x128xf32>
      %245 = math.tanh %244 : vector<8x128xf32>
      %246 = vector.extract_strided_slice %231 {offsets = [0, 384], sizes = [8, 128], strides = [1, 1]} : vector<8x512xf32> to vector<8x128xf32>
      %247 = arith.negf %246 : vector<8x128xf32>
      %248 = math.exp %247 : vector<8x128xf32>
      %cst_56 = arith.constant 1.000000e+00 : f32
      %249 = vector.broadcast %cst_56 : f32 to vector<8x128xf32>
      %250 = arith.addf %249, %248 : vector<8x128xf32>
      %251 = arith.divf %249, %250 : vector<8x128xf32>
      %252 = arith.mulf %243, %223 : vector<8x128xf32>
      %253 = arith.mulf %237, %245 : vector<8x128xf32>
      %254 = arith.addf %252, %253 : vector<8x128xf32>
      %255 = math.tanh %254 : vector<8x128xf32>
      %256 = arith.mulf %251, %255 : vector<8x128xf32>
      %c5_i32 = arith.constant 5 : i32
      %257 = arith.addi %15, %c5_i32 : i32
      %258 = vector.broadcast %257 : i32 to vector<8x1xi32>
      %259 = arith.cmpi slt, %258, %14 : vector<8x1xi32>
      %260 = vector.shape_cast %259 : vector<8x1xi1> to vector<8x1xi1>
      %261 = vector.broadcast %260 : vector<8x1xi1> to vector<8x128xi1>
      %262 = arith.select %261, %256, %220 : vector<8x128xi1>, vector<8x128xf32>
      %263 = vector.shape_cast %259 : vector<8x1xi1> to vector<8x1xi1>
      %264 = vector.broadcast %263 : vector<8x1xi1> to vector<8x128xi1>
      %265 = arith.select %264, %254, %223 : vector<8x128xi1>, vector<8x128xf32>
      %cst_57 = arith.constant 0.000000e+00 : f32
      %266 = vector.broadcast %cst_57 : f32 to vector<8x128xf32>
      %267 = vector.shape_cast %259 : vector<8x1xi1> to vector<8x1xi1>
      %268 = vector.broadcast %267 : vector<8x1xi1> to vector<8x128xi1>
      %269 = arith.select %268, %256, %266 : vector<8x128xi1>, vector<8x128xf32>
      %c0_58 = arith.constant 0 : index
      %c640 = arith.constant 640 : index
      %270 = vector.load %arg8[%c0_58, %c640] : memref<8x1024xf32, #tpu.memory_space<vmem>>, vector<8x128xf32>
      tpu.vector_store %arg8[%c0_58, %c640], %269 {strides = array<i32>} : memref<8x1024xf32, #tpu.memory_space<vmem>>, vector<8x128xf32>,
      %c0_59 = arith.constant 0 : index
      %c3072 = arith.constant 3072 : index
      %271 = vector.load %arg4[%c0_59, %c3072] : memref<8x4096xf32, #tpu.memory_space<vmem>>, vector<8x512xf32>
      %cst_60 = arith.constant dense<0.000000e+00> : vector<8x512xf32>
      %272 = tpu.matmul %262, %16, %cst_60 {dimension_numbers = #tpu.dot_dimension_numbers<[1], [0], [0], [1], [0, 0, 1, 1], [], []>} : vector<8x128xf32>, vector<128x512xf32>, vector<8x512xf32> -> vector<8x512xf32>
      %273 = arith.addf %271, %272 : vector<8x512xf32>
      %274 = vector.extract_strided_slice %273 {offsets = [0, 0], sizes = [8, 128], strides = [1, 1]} : vector<8x512xf32> to vector<8x128xf32>
      %275 = arith.negf %274 : vector<8x128xf32>
      %276 = math.exp %275 : vector<8x128xf32>
      %cst_61 = arith.constant 1.000000e+00 : f32
      %277 = vector.broadcast %cst_61 : f32 to vector<8x128xf32>
      %278 = arith.addf %277, %276 : vector<8x128xf32>
      %279 = arith.divf %277, %278 : vector<8x128xf32>
      %280 = vector.extract_strided_slice %273 {offsets = [0, 128], sizes = [8, 128], strides = [1, 1]} : vector<8x512xf32> to vector<8x128xf32>
      %281 = arith.negf %280 : vector<8x128xf32>
      %282 = math.exp %281 : vector<8x128xf32>
      %cst_62 = arith.constant 1.000000e+00 : f32
      %283 = vector.broadcast %cst_62 : f32 to vector<8x128xf32>
      %284 = arith.addf %283, %282 : vector<8x128xf32>
      %285 = arith.divf %283, %284 : vector<8x128xf32>
      %286 = vector.extract_strided_slice %273 {offsets = [0, 256], sizes = [8, 128], strides = [1, 1]} : vector<8x512xf32> to vector<8x128xf32>
      %287 = math.tanh %286 : vector<8x128xf32>
      %288 = vector.extract_strided_slice %273 {offsets = [0, 384], sizes = [8, 128], strides = [1, 1]} : vector<8x512xf32> to vector<8x128xf32>
      %289 = arith.negf %288 : vector<8x128xf32>
      %290 = math.exp %289 : vector<8x128xf32>
      %cst_63 = arith.constant 1.000000e+00 : f32
      %291 = vector.broadcast %cst_63 : f32 to vector<8x128xf32>
      %292 = arith.addf %291, %290 : vector<8x128xf32>
      %293 = arith.divf %291, %292 : vector<8x128xf32>
      %294 = arith.mulf %285, %265 : vector<8x128xf32>
      %295 = arith.mulf %279, %287 : vector<8x128xf32>
      %296 = arith.addf %294, %295 : vector<8x128xf32>
      %297 = math.tanh %296 : vector<8x128xf32>
      %298 = arith.mulf %293, %297 : vector<8x128xf32>
      %c6_i32 = arith.constant 6 : i32
      %299 = arith.addi %15, %c6_i32 : i32
      %300 = vector.broadcast %299 : i32 to vector<8x1xi32>
      %301 = arith.cmpi slt, %300, %14 : vector<8x1xi32>
      %302 = vector.shape_cast %301 : vector<8x1xi1> to vector<8x1xi1>
      %303 = vector.broadcast %302 : vector<8x1xi1> to vector<8x128xi1>
      %304 = arith.select %303, %298, %262 : vector<8x128xi1>, vector<8x128xf32>
      %305 = vector.shape_cast %301 : vector<8x1xi1> to vector<8x1xi1>
      %306 = vector.broadcast %305 : vector<8x1xi1> to vector<8x128xi1>
      %307 = arith.select %306, %296, %265 : vector<8x128xi1>, vector<8x128xf32>
      %cst_64 = arith.constant 0.000000e+00 : f32
      %308 = vector.broadcast %cst_64 : f32 to vector<8x128xf32>
      %309 = vector.shape_cast %301 : vector<8x1xi1> to vector<8x1xi1>
      %310 = vector.broadcast %309 : vector<8x1xi1> to vector<8x128xi1>
      %311 = arith.select %310, %298, %308 : vector<8x128xi1>, vector<8x128xf32>
      %c0_65 = arith.constant 0 : index
      %c768 = arith.constant 768 : index
      %312 = vector.load %arg8[%c0_65, %c768] : memref<8x1024xf32, #tpu.memory_space<vmem>>, vector<8x128xf32>
      tpu.vector_store %arg8[%c0_65, %c768], %311 {strides = array<i32>} : memref<8x1024xf32, #tpu.memory_space<vmem>>, vector<8x128xf32>,
      %c0_66 = arith.constant 0 : index
      %c3584 = arith.constant 3584 : index
      %313 = vector.load %arg4[%c0_66, %c3584] : memref<8x4096xf32, #tpu.memory_space<vmem>>, vector<8x512xf32>
      %cst_67 = arith.constant dense<0.000000e+00> : vector<8x512xf32>
      %314 = tpu.matmul %304, %16, %cst_67 {dimension_numbers = #tpu.dot_dimension_numbers<[1], [0], [0], [1], [0, 0, 1, 1], [], []>} : vector<8x128xf32>, vector<128x512xf32>, vector<8x512xf32> -> vector<8x512xf32>
      %315 = arith.addf %313, %314 : vector<8x512xf32>
      %316 = vector.extract_strided_slice %315 {offsets = [0, 0], sizes = [8, 128], strides = [1, 1]} : vector<8x512xf32> to vector<8x128xf32>
      %317 = arith.negf %316 : vector<8x128xf32>
      %318 = math.exp %317 : vector<8x128xf32>
      %cst_68 = arith.constant 1.000000e+00 : f32
      %319 = vector.broadcast %cst_68 : f32 to vector<8x128xf32>
      %320 = arith.addf %319, %318 : vector<8x128xf32>
      %321 = arith.divf %319, %320 : vector<8x128xf32>
      %322 = vector.extract_strided_slice %315 {offsets = [0, 128], sizes = [8, 128], strides = [1, 1]} : vector<8x512xf32> to vector<8x128xf32>
      %323 = arith.negf %322 : vector<8x128xf32>
      %324 = math.exp %323 : vector<8x128xf32>
      %cst_69 = arith.constant 1.000000e+00 : f32
      %325 = vector.broadcast %cst_69 : f32 to vector<8x128xf32>
      %326 = arith.addf %325, %324 : vector<8x128xf32>
      %327 = arith.divf %325, %326 : vector<8x128xf32>
      %328 = vector.extract_strided_slice %315 {offsets = [0, 256], sizes = [8, 128], strides = [1, 1]} : vector<8x512xf32> to vector<8x128xf32>
      %329 = math.tanh %328 : vector<8x128xf32>
      %330 = vector.extract_strided_slice %315 {offsets = [0, 384], sizes = [8, 128], strides = [1, 1]} : vector<8x512xf32> to vector<8x128xf32>
      %331 = arith.negf %330 : vector<8x128xf32>
      %332 = math.exp %331 : vector<8x128xf32>
      %cst_70 = arith.constant 1.000000e+00 : f32
      %333 = vector.broadcast %cst_70 : f32 to vector<8x128xf32>
      %334 = arith.addf %333, %332 : vector<8x128xf32>
      %335 = arith.divf %333, %334 : vector<8x128xf32>
      %336 = arith.mulf %327, %307 : vector<8x128xf32>
      %337 = arith.mulf %321, %329 : vector<8x128xf32>
      %338 = arith.addf %336, %337 : vector<8x128xf32>
      %339 = math.tanh %338 : vector<8x128xf32>
      %340 = arith.mulf %335, %339 : vector<8x128xf32>
      %c7_i32 = arith.constant 7 : i32
      %341 = arith.addi %15, %c7_i32 : i32
      %342 = vector.broadcast %341 : i32 to vector<8x1xi32>
      %343 = arith.cmpi slt, %342, %14 : vector<8x1xi32>
      %344 = vector.shape_cast %343 : vector<8x1xi1> to vector<8x1xi1>
      %345 = vector.broadcast %344 : vector<8x1xi1> to vector<8x128xi1>
      %346 = arith.select %345, %340, %304 : vector<8x128xi1>, vector<8x128xf32>
      %347 = vector.shape_cast %343 : vector<8x1xi1> to vector<8x1xi1>
      %348 = vector.broadcast %347 : vector<8x1xi1> to vector<8x128xi1>
      %349 = arith.select %348, %338, %307 : vector<8x128xi1>, vector<8x128xf32>
      %cst_71 = arith.constant 0.000000e+00 : f32
      %350 = vector.broadcast %cst_71 : f32 to vector<8x128xf32>
      %351 = vector.shape_cast %343 : vector<8x1xi1> to vector<8x1xi1>
      %352 = vector.broadcast %351 : vector<8x1xi1> to vector<8x128xi1>
      %353 = arith.select %352, %340, %350 : vector<8x128xi1>, vector<8x128xf32>
      %c0_72 = arith.constant 0 : index
      %c896 = arith.constant 896 : index
      %354 = vector.load %arg8[%c0_72, %c896] : memref<8x1024xf32, #tpu.memory_space<vmem>>, vector<8x128xf32>
      tpu.vector_store %arg8[%c0_72, %c896], %353 {strides = array<i32>} : memref<8x1024xf32, #tpu.memory_space<vmem>>, vector<8x128xf32>,
      %c0_73 = arith.constant 0 : index
      %c0_74 = arith.constant 0 : index
      %355 = vector.load %arg11[%c0_73, %c0_74] : memref<8x128xf32, #tpu.memory_space<vmem>>, vector<8x128xf32>
      tpu.vector_store %arg11[%c0_73, %c0_74], %346 {strides = array<i32>} : memref<8x128xf32, #tpu.memory_space<vmem>>, vector<8x128xf32>,
      %c0_75 = arith.constant 0 : index
      %c0_76 = arith.constant 0 : index
      %356 = vector.load %arg12[%c0_75, %c0_76] : memref<8x128xf32, #tpu.memory_space<vmem>>, vector<8x128xf32>
      tpu.vector_store %arg12[%c0_75, %c0_76], %349 {strides = array<i32>} : memref<8x128xf32, #tpu.memory_space<vmem>>, vector<8x128xf32>,
    } else {
    }
    %c0_2 = arith.constant 0 : index
    %7 = memref.load %arg2[%c0_2] : memref<1xi32, #tpu.memory_space<smem>>
    %8 = arith.cmpi sge, %arg1, %7 : i32
    %9 = arith.extui %8 : i1 to i32
    %c0_i32_3 = arith.constant 0 : i32
    %10 = arith.cmpi ne, %9, %c0_i32_3 : i32
    scf.if %10 {
      %cst = arith.constant 0.000000e+00 : f32
      %14 = vector.broadcast %cst : f32 to vector<8x1024xf32>
      %c0_5 = arith.constant 0 : index
      %c0_6 = arith.constant 0 : index
      %15 = vector.load %arg8[%c0_5, %c0_6] : memref<8x1024xf32, #tpu.memory_space<vmem>>, vector<8x1024xf32>
      tpu.vector_store %arg8[%c0_5, %c0_6], %14 {strides = array<i32>} : memref<8x1024xf32, #tpu.memory_space<vmem>>, vector<8x1024xf32>,
    } else {
    }
    %c2_i32 = arith.constant 2 : i32
    %11 = arith.cmpi eq, %arg1, %c2_i32 : i32
    %12 = arith.extui %11 : i1 to i32
    %c0_i32_4 = arith.constant 0 : i32
    %13 = arith.cmpi ne, %12, %c0_i32_4 : i32
    scf.if %13 {
      %c0_5 = arith.constant 0 : index
      %c0_6 = arith.constant 0 : index
      %14 = vector.load %arg6[%c0_5, %c0_6] : memref<128x128xf32, #tpu.memory_space<vmem>>, vector<128x128xf32>
      %c0_7 = arith.constant 0 : index
      %c0_8 = arith.constant 0 : index
      %15 = vector.load %arg7[%c0_7, %c0_8] : memref<1x128xf32, #tpu.memory_space<vmem>>, vector<1x128xf32>
      %c0_9 = arith.constant 0 : index
      %c0_10 = arith.constant 0 : index
      %16 = vector.load %arg11[%c0_9, %c0_10] : memref<8x128xf32, #tpu.memory_space<vmem>>, vector<8x128xf32>
      %cst = arith.constant dense<0.000000e+00> : vector<8x128xf32>
      %17 = tpu.matmul %16, %14, %cst {dimension_numbers = #tpu.dot_dimension_numbers<[1], [0], [0], [1], [0, 0, 1, 1], [], []>} : vector<8x128xf32>, vector<128x128xf32>, vector<8x128xf32> -> vector<8x128xf32>
      %18 = vector.broadcast %15 : vector<1x128xf32> to vector<8x128xf32>
      %19 = arith.addf %17, %18 : vector<8x128xf32>
      %c0_11 = arith.constant 0 : index
      %c0_12 = arith.constant 0 : index
      %20 = vector.load %arg9[%c0_11, %c0_12] : memref<8x128xf32, #tpu.memory_space<vmem>>, vector<8x128xf32>
      tpu.vector_store %arg9[%c0_11, %c0_12], %19 {strides = array<i32>} : memref<8x128xf32, #tpu.memory_space<vmem>>, vector<8x128xf32>,
      %c0_13 = arith.constant 0 : index
      %c0_14 = arith.constant 0 : index
      %21 = vector.load %arg12[%c0_13, %c0_14] : memref<8x128xf32, #tpu.memory_space<vmem>>, vector<8x128xf32>
      %cst_15 = arith.constant dense<0.000000e+00> : vector<8x128xf32>
      %22 = tpu.matmul %21, %14, %cst_15 {dimension_numbers = #tpu.dot_dimension_numbers<[1], [0], [0], [1], [0, 0, 1, 1], [], []>} : vector<8x128xf32>, vector<128x128xf32>, vector<8x128xf32> -> vector<8x128xf32>
      %23 = vector.broadcast %15 : vector<1x128xf32> to vector<8x128xf32>
      %24 = arith.addf %22, %23 : vector<8x128xf32>
      %c0_16 = arith.constant 0 : index
      %c0_17 = arith.constant 0 : index
      %25 = vector.load %arg10[%c0_16, %c0_17] : memref<8x128xf32, #tpu.memory_space<vmem>>, vector<8x128xf32>
      tpu.vector_store %arg10[%c0_16, %c0_17], %24 {strides = array<i32>} : memref<8x128xf32, #tpu.memory_space<vmem>>, vector<8x128xf32>,
    } else {
    }
    return
  }
  func.func @transform_0(%arg0: i32, %arg1: i32, %arg2: memref<1xi32, #tpu.memory_space<smem>>) -> (i32, i32) {
    %c0_i32 = arith.constant 0 : i32
    %c0_i32_0 = arith.constant 0 : i32
    return %arg0, %c0_i32 : i32, i32
  }
  func.func @transform_1(%arg0: i32, %arg1: i32, %arg2: memref<1xi32, #tpu.memory_space<smem>>) -> (i32, i32) {
    %c0_i32 = arith.constant 0 : i32
    return %arg0, %arg1 : i32, i32
  }
  func.func @transform_2(%arg0: i32, %arg1: i32, %arg2: memref<1xi32, #tpu.memory_space<smem>>) -> (i32, i32) {
    %c0_i32 = arith.constant 0 : i32
    %c0_i32_0 = arith.constant 0 : i32
    %c0_i32_1 = arith.constant 0 : i32
    return %c0_i32, %c0_i32_0 : i32, i32
  }
  func.func @transform_3(%arg0: i32, %arg1: i32, %arg2: memref<1xi32, #tpu.memory_space<smem>>) -> (i32, i32) {
    %c0_i32 = arith.constant 0 : i32
    %c0_i32_0 = arith.constant 0 : i32
    %c0_i32_1 = arith.constant 0 : i32
    return %c0_i32, %c0_i32_0 : i32, i32
  }
  func.func @transform_4(%arg0: i32, %arg1: i32, %arg2: memref<1xi32, #tpu.memory_space<smem>>) -> (i32, i32) {
    %c0_i32 = arith.constant 0 : i32
    %c0_i32_0 = arith.constant 0 : i32
    %c0_i32_1 = arith.constant 0 : i32
    return %c0_i32, %c0_i32_0 : i32, i32
  }
  func.func @transform_5(%arg0: i32, %arg1: i32, %arg2: memref<1xi32, #tpu.memory_space<smem>>) -> (i32, i32) {
    %c0_i32 = arith.constant 0 : i32
    return %arg0, %arg1 : i32, i32
  }
  func.func @transform_6(%arg0: i32, %arg1: i32, %arg2: memref<1xi32, #tpu.memory_space<smem>>) -> (i32, i32) {
    %c0_i32 = arith.constant 0 : i32
    %c0_i32_0 = arith.constant 0 : i32
    return %arg0, %c0_i32 : i32, i32
  }
  func.func @transform_7(%arg0: i32, %arg1: i32, %arg2: memref<1xi32, #tpu.memory_space<smem>>) -> (i32, i32) {
    %c0_i32 = arith.constant 0 : i32
    %c0_i32_0 = arith.constant 0 : i32
    return %arg0, %c0_i32 : i32, i32
  }
}

</mosaic_0001>

<bundles_post_ra>
// kernel: encoder_lstm_pallas.1
= control target key start
LH: loop header
LB: loop body
LE: loop exit
PB: predicated region body
PF: predicated region fallthrough
CT: control target
= control target key end

     0   :  { %s3216_s29 = smov 0   ;;  %s3218_s30 = smov 0   ;;  %s3988_s0 = inlined_call_operand.<no memory space> [shape: s32[1], index: 0, kind: input, shape index: {}]   ;;  %s3989_s1 = inlined_call_operand.vmem [shape: s32[8,1], index: 1, kind: input, shape index: {}]   ;;  %s3990_s2 = inlined_call_operand.vmem [shape: f32[8,12288], index: 2, kind: input, shape index: {}]   ;;  %s3991_s3 = inlined_call_operand.vmem [shape: f32[128,512], index: 3, kind: input, shape index: {}]   ;;  %s3992_s4 = inlined_call_operand.vmem [shape: f32[128,128], index: 4, kind: input, shape index: {}]   ;;  %s3993_s5 = inlined_call_operand.vmem [shape: f32[1,128], index: 5, kind: input, shape index: {}]   ;;  %s3994_s6 = inlined_call_operand.vmem [shape: f32[8,3072], index: 6, kind: output, shape index: {0}]   ;;  %s3995_s7 = inlined_call_operand.vmem [shape: f32[8,128], index: 7, kind: output, shape index: {1}]   ;;  %s3996_s8 = inlined_call_operand.vmem [shape: f32[8,128], index: 8, kind: output, shape index: {2}]  }
   0x1   :  { %14 = sst [smem:[#allocation5]] %s3988_s0  ;;  %s3220_s9 = smov 0  }
   0x2 LB: > { %s29_s0 = sadd.s32 1, %s3155_s30  ;;  %p2273_p0 = scmp.ge.s32.totalorder %s3159_s9, 1  ;;  %s3159_s9 = sphi %s3220_s9, %s20_s9   ;;  %s3155_s30 = sphi %s3218_s30, %s3998_s30   ;;  %s3151_s29 = sphi %s3216_s29, %s3997_s29  }
   0x3   : > { %p30_p1 = scmp.ge.s32.totalorder %s29_s0, 3  ;;  %p274_p2 = scmp.lt.s32.totalorder %s3159_s9, 4 }
   0x5   : > { %s4000_s0 = smov (%p30_p1, %s29_s0), 0  ;;  %p275_p3 = pnand %p2273_p0, %p274_p2 }
   0x6   : > { %s2274_s10 = sshll.u32 (!%p275_p3), %s3151_s29, 5  ;;  %s3238_s11 = sshll.u32 (!%p275_p3), %s3151_s29, 3 }
   0x7   : > { %278 = sbr.rel (%p275_p3) target bundleno = 2402 (0x962), region = 40  ;;  %p333_p4 = scmp.lt.s32.totalorder (!%p275_p3), %s2274_s10, 95 }
   0x8   : > { %p343_p5 = scmp.lt.s32.totalorder (!%p275_p3), %s3238_s11, 23  ;;  %p2278_p6 = scmp.ne.s32.totalorder (!%p275_p3), %s3151_s29, 0 }
   0xe   : > { %s4002_s10 = smov (!%p333_p4, %s2274_s10), 95  ;;  %361 = sbr.rel (%p2278_p6) target bundleno = 21 (0x15), region = 44 }
   0xf   : > { %s344_s12 = scalar_select %p343_p5, %s3238_s11, 23 }
  0x10   : > { %s2275_s13 = sshll.u32 %s4002_s10, 3  ;;  %v3161_v0 = vmov (!%p2278_p6), 0.0  }
  0x11   : > { %s3245_s16 = scalar_lea.vmem %s3990_s2, %s2275_s13  ;;  %s2277_s17 = sshll.u32 %s344_s12, 3  ;;  %362 = vst [vmem:[#allocation2] sm:$0xff] (!%p2278_p6), %v3161_v0  ;;  %363 = vst [vmem:[#allocation3] sm:$0xff] (!%p2278_p6), %v3161_v0 }
  0x12   : > { %s3250_s20 = scalar_lea.vmem %s3994_s6, %s2277_s17 }
  0x15 PF: > { %s364_s21 = sld [smem:[#allocation5]] }
  0x1b   : > { %p2279_p7 = scmp.ge.s32.totalorder %s3151_s29, %s364_s21 }
  0x1c   : > { %v372_v1 = vld [vmem:[%s3991_s3 + $0x8] sm:$0xff] (!%p2279_p7)  ;;  %v371_v3 = vld [vmem:[%s3991_s3] sm:$0xff] (!%p2279_p7)  ;;  %v3162_v8 = vmov (!%p2279_p7), 0.0   ;;  %v3163_v14 = vmov (!%p2279_p7), 0   ;;  %v374_v21 = vld [vmem:[%s3991_s3 + $0x18] sm:$0xff] (!%p2279_p7)  ;;  %s796_s22 = sadd.s32 (!%p2279_p7), 1, %s3238_s11 }
  0x1d   : > { %368 = sbr.rel (%p2279_p7) target bundleno = 2137 (0x859), region = 48  ;;  %v376_v2 = vld [vmem:[%s3991_s3 + $0x28] sm:$0xff] (!%p2279_p7)  ;;  %v375_v5 = vld [vmem:[%s3991_s3 + $0x20] sm:$0xff] (!%p2279_p7)  ;;  %505 = vmatprep.mubr.f32.mxu0 (!%p2279_p7), %v3162_v8  ;;  %576 = vmatprep.mubr.f32.mxu1 (!%p2279_p7), %v3162_v8  ;;  %v378_v22 = vld [vmem:[%s3991_s3 + $0x38] sm:$0xff] (!%p2279_p7)  ;;  %s1354_s26 = sadd.s32 (!%p2279_p7), 4, %s3238_s11 }
  0x1e   : > { %v3263_v4 = vpack.c.bf16 (!%p2279_p7), %v376_v2, %v372_v1  ;;  %v380_v6 = vld [vmem:[%s3991_s3 + $0x48] sm:$0xff] (!%p2279_p7)  ;;  %v3276_v9 = vpack.c.bf16 (!%p2279_p7), %v375_v5, %v371_v3  ;;  %v379_v11 = vld [vmem:[%s3991_s3 + $0x40] sm:$0xff] (!%p2279_p7)  ;;  %3007 = vset.pattern.permute.xlu0 (!%p2279_p7), %v3163_v14  ;;  %3008 = vset.pattern.permute.xlu1 (!%p2279_p7), %v3163_v14  ;;  %v3319_v24 = vpack.c.bf16 (!%p2279_p7), %v378_v22, %v374_v21  ;;  %v373_v25 = vld [vmem:[%s3991_s3 + $0x10] sm:$0xff] (!%p2279_p7)  ;;  %s1726_s28 = sadd.s32 (!%p2279_p7), 6, %s3238_s11  ;;  %s1168_s10 = sadd.s32 (!%p2279_p7), 3, %s3238_s11 }
  0x1f   : > { %v384_v7 = vld [vmem:[%s3991_s3 + $0x68] sm:$0xff] (!%p2279_p7)  ;;  %v383_v12 = vld [vmem:[%s3991_s3 + $0x60] sm:$0xff] (!%p2279_p7)  ;;  %v377_v26 = vld [vmem:[%s3991_s3 + $0x30] sm:$0xff] (!%p2279_p7)  ;;  %s1540_s12 = sadd.s32 (!%p2279_p7), 5, %s3238_s11  ;;  %s1912_s13 = sadd.s32 (!%p2279_p7), 7, %s3238_s11 }
  0x20   : > { %v3278_v10 = vpack.c.bf16 (!%p2279_p7), %v384_v7, %v380_v6  ;;  %v388_v13 = vld [vmem:[%s3991_s3 + $0x88] sm:$0xff] (!%p2279_p7)  ;;  %2417 = vmatprep.subr.bf16.mxu0 (!%p2279_p7), %v3263_v4  ;;  %v3296_v16 = vpack.c.bf16 (!%p2279_p7), %v383_v12, %v379_v11  ;;  %v387_v17 = vld [vmem:[%s3991_s3 + $0x80] sm:$0xff] (!%p2279_p7)  ;;  %v3327_v27 = vpack.c.bf16 (!%p2279_p7), %v377_v26, %v373_v25  ;;  %2449 = vmatprep.subr.bf16.mxu1 (!%p2279_p7), %v3319_v24  ;;  %v382_v29 = vld [vmem:[%s3991_s3 + $0x58] sm:$0xff] (!%p2279_p7)  ;;  %v611_v11 = vstv (!%p2279_p7), %s3238_s11 }
  0x21   : > { %v392_v15 = vld [vmem:[%s3991_s3 + $0xa8] sm:$0xff] (!%p2279_p7)  ;;  %2419 = vmatpush1.bf16.msra.mxu0 (!%p2279_p7), %v3276_v9  ;;  %v391_v18 = vld [vmem:[%s3991_s3 + $0xa0] sm:$0xff] (!%p2279_p7)  ;;  %v386_v30 = vld [vmem:[%s3991_s3 + $0x78] sm:$0xff] (!%p2279_p7)  ;;  %v797_v12 = vstv (!%p2279_p7), %s796_s22  ;;  %s982_s22 = sadd.s32 (!%p2279_p7), 2, %s3238_s11 }
  0x22   : > { %2421 = vmatprep.subr.bf16.mxu0 (!%p2279_p7), %v3278_v10  ;;  %v3305_v19 = vpack.c.bf16 (!%p2279_p7), %v392_v15, %v388_v13  ;;  %v396_v20 = vld [vmem:[%s3991_s3 + $0xc8] sm:$0xff] (!%p2279_p7)  ;;  %v3330_v28 = vpack.c.bf16 (!%p2279_p7), %v391_v18, %v387_v17  ;;  %v381_v31 = vld [vmem:[%s3991_s3 + $0x50] sm:$0xff] (!%p2279_p7)  ;;  %v395_v33 = vld [vmem:[%s3991_s3 + $0xc0] sm:$0xff] (!%p2279_p7)  ;;  %2451 = vmatpush1.bf16.msra.mxu1 (!%p2279_p7), %v3327_v27  ;;  %v3352_v35 = vpack.c.bf16 (!%p2279_p7), %v386_v30, %v382_v29 }
  0x23   : > { %v400_v23 = vld [vmem:[%s3991_s3 + $0xe8] sm:$0xff] (!%p2279_p7)  ;;  %v399_v34 = vld [vmem:[%s3991_s3 + $0xe0] sm:$0xff] (!%p2279_p7)  ;;  %v385_v36 = vld [vmem:[%s3991_s3 + $0x70] sm:$0xff] (!%p2279_p7) }
  0x24   : > { %v3343_v32 = vpack.c.bf16 %v400_v23, %v396_v20  ;;  %v404_v37 = vld [vmem:[%s3991_s3 + $0x108] sm:$0xff]  ;;  %v3363_v39 = vpack.c.bf16 %v385_v36, %v381_v31  ;;  %v390_v40 = vld [vmem:[%s3991_s3 + $0x98] sm:$0xff]  ;;  %2453 = vmatprep.subr.bf16.mxu1 %v3352_v35  ;;  %v389_v42 = vld [vmem:[%s3991_s3 + $0x90] sm:$0xff]  ;;  %v3379_v44 = vpack.c.bf16 %v399_v34, %v395_v33  ;;  %v1355_v34 = vstv %s1354_s26 }
  0x25   : > { %2423 = vmatpush1.bf16.msra.mxu0 %v3296_v16  ;;  %v408_v38 = vld [vmem:[%s3991_s3 + $0x128] sm:$0xff]  ;;  %v394_v41 = vld [vmem:[%s3991_s3 + $0xb8] sm:$0xff]  ;;  %v393_v43 = vld [vmem:[%s3991_s3 + $0xb0] sm:$0xff] }
  0x26   : > { %2425 = vmatprep.subr.bf16.mxu0 %v3305_v19  ;;  %v403_v45 = vld [vmem:[%s3991_s3 + $0x100] sm:$0xff]  ;;  %v3387_v47 = vpack.c.bf16 %v394_v41, %v390_v40  ;;  %v3390_v48 = vpack.c.bf16 %v408_v38, %v404_v37  ;;  %2455 = vmatpush1.bf16.msra.mxu1 %v3363_v39  ;;  %v412_v49 = vld [vmem:[%s3991_s3 + $0x148] sm:$0xff]  ;;  %v3396_v50 = vpack.c.bf16 %v393_v43, %v389_v42  ;;  %v398_v51 = vld [vmem:[%s3991_s3 + $0xd8] sm:$0xff] }
  0x27   : > { %v407_v46 = vld [vmem:[%s3991_s3 + $0x120] sm:$0xff]  ;;  %v402_v52 = vld [vmem:[%s3991_s3 + $0xf8] sm:$0xff]  ;;  %v416_v53 = vld [vmem:[%s3991_s3 + $0x168] sm:$0xff] }
  0x28   : > { %2457 = vmatprep.subr.bf16.mxu1 %v3387_v47  ;;  %v3408_v54 = vpack.c.bf16 %v402_v52, %v398_v51  ;;  %v397_v55 = vld [vmem:[%s3991_s3 + $0xd0] sm:$0xff]  ;;  %v3417_v57 = vpack.c.bf16 %v407_v46, %v403_v45  ;;  %v406_v58 = vld [vmem:[%s3991_s3 + $0x118] sm:$0xff]  ;;  %v3427_v60 = vpack.c.bf16 %v416_v53, %v412_v49  ;;  %v411_v61 = vld [vmem:[%s3991_s3 + $0x140] sm:$0xff]  ;;  %v1727_v52 = vstv %s1726_s28 }
  0x29   : > { %2427 = vmatpush1.bf16.msra.mxu0 %v3330_v28  ;;  %v401_v56 = vld [vmem:[%s3991_s3 + $0xf0] sm:$0xff]  ;;  %v410_v59 = vld [vmem:[%s3991_s3 + $0x138] sm:$0xff]  ;;  %v415_v62 = vld [vmem:[%s3991_s3 + $0x160] sm:$0xff] }
  0x2a   : > { %2429 = vmatprep.subr.bf16.mxu0 %v3343_v32  ;;  %2459 = vmatpush1.bf16.msra.mxu1 %v3396_v50  ;;  %v420_v63 = vld [vmem:[%s3991_s3 + $0x188] sm:$0xff]  ;;  %v3439_v0 = vpack.c.bf16 %v401_v56, %v397_v55  ;;  %v3445_v2 = vpack.c.bf16 %v410_v59, %v406_v58  ;;  %v405_v3 = vld [vmem:[%s3991_s3 + $0x110] sm:$0xff]  ;;  %v414_v6 = vld [vmem:[%s3991_s3 + $0x158] sm:$0xff]  ;;  %v3461_v13 = vpack.c.bf16 %v415_v62, %v411_v61 }
  0x2b   : > { %v424_v1 = vld [vmem:[%s3991_s3 + $0x1a8] sm:$0xff]  ;;  %2461 = vmatprep.subr.bf16.mxu1 %v3408_v54  ;;  %v409_v5 = vld [vmem:[%s3991_s3 + $0x130] sm:$0xff]  ;;  %v418_v7 = vld [vmem:[%s3991_s3 + $0x178] sm:$0xff] }
  0x2c   : > { %v419_v15 = vld [vmem:[%s3991_s3 + $0x180] sm:$0xff]  ;;  %v3468_v17 = vpack.c.bf16 %v424_v1, %v420_v63  ;;  %v428_v20 = vld [vmem:[%s3991_s3 + $0x1c8] sm:$0xff]  ;;  %v3477_v21 = vpack.c.bf16 %v409_v5, %v405_v3  ;;  %v3488_v25 = vpack.c.bf16 %v418_v7, %v414_v6  ;;  %v413_v26 = vld [vmem:[%s3991_s3 + $0x150] sm:$0xff] }
  0x2d   : > { %2431 = vmatpush1.bf16.msra.mxu0 %v3379_v44  ;;  %v423_v18 = vld [vmem:[%s3991_s3 + $0x1a0] sm:$0xff]  ;;  %v432_v23 = vld [vmem:[%s3991_s3 + $0x1e8] sm:$0xff]  ;;  %v417_v29 = vld [vmem:[%s3991_s3 + $0x170] sm:$0xff] }
  0x2e   : > { %2433 = vmatprep.subr.bf16.mxu0 %v3390_v48  ;;  %2463 = vmatpush1.bf16.msra.mxu1 %v3439_v0  ;;  %v3482_v22 = vld [vmem:[%s3989_s1] sm:$0xff]  ;;  %v422_v30 = vld [vmem:[%s3991_s3 + $0x198] sm:$0xff]  ;;  %v3506_v36 = vpack.c.bf16 %v423_v18, %v419_v15  ;;  %v3510_v37 = vpack.c.bf16 %v432_v23, %v428_v20  ;;  %v3519_v41 = vpack.c.bf16 %v417_v29, %v413_v26  ;;  %v421_v45 = vld [vmem:[%s3991_s3 + $0x190] sm:$0xff] }
  0x2f   : > { %2465 = vmatprep.subr.bf16.mxu1 %v3445_v2  ;;  %vm612_vm0 = vcmp.lt.s32.totalorder %v611_v11, %v3482_v22  ;;  %vm798_vm1 = vcmp.lt.s32.totalorder %v797_v12, %v3482_v22  ;;  %v426_v31 = vld [vmem:[%s3991_s3 + $0x1b8] sm:$0xff]  ;;  %v427_v38 = vld [vmem:[%s3991_s3 + $0x1c0] sm:$0xff]  ;;  %v425_v46 = vld [vmem:[%s3991_s3 + $0x1b0] sm:$0xff]  ;;  %vm1356_vm2 = vcmp.lt.s32.totalorder %v1355_v34, %v3482_v22  ;;  %vm1728_vm3 = vcmp.lt.s32.totalorder %v1727_v52, %v3482_v22 }
  0x30   : > { %v613_v33 = vsel %vm612_vm0, 1, %v3163_v14  ;;  %v431_v40 = vld [vmem:[%s3991_s3 + $0x1e0] sm:$0xff]  ;;  %v799_v42 = vsel %vm798_vm1, 1, %v3163_v14  ;;  %v3523_v43 = vpack.c.bf16 %v426_v31, %v422_v30  ;;  %v430_v49 = vld [vmem:[%s3991_s3 + $0x1d8] sm:$0xff]  ;;  %v3543_v55 = vpack.c.bf16 %v425_v46, %v421_v45  ;;  %v429_v59 = vld [vmem:[%s3991_s3 + $0x1d0] sm:$0xff] }
  0x31   : > { %2435 = vmatpush1.bf16.msra.mxu0 %v3417_v57  ;;  %615 = vperm.xlu0 %3007, %v613_v33   ;;  %v434_v51 = vld [vmem:[%s3991_s3 + $0x1f8] sm:$0xff]  ;;  %v3539_v53 = vpack.c.bf16 %v431_v40, %v427_v38  ;;  %v1357_v56 = vsel %vm1356_vm2, 1, %v3163_v14  ;;  %v433_v61 = vld [vmem:[%s3991_s3 + $0x1f0] sm:$0xff]  ;;  %v3557_v62 = vld [vmem:[#allocation2] sm:$0xff]  ;;  %v1729_v1 = vsel %vm1728_vm3, 1, %v3163_v14 }
  0x32   : > { %2437 = vmatprep.subr.bf16.mxu0 %v3427_v60  ;;  %2467 = vmatpush1.bf16.msra.mxu1 %v3477_v21  ;;  %v3547_v58 = vpack.c.bf16 %v434_v51, %v430_v49  ;;  %v3560_v63 = vpack.c.bf16 %v433_v61, %v429_v59  ;;  %v437_v3 = vld [vmem:[%s3245_s16] sm:$0xff]  ;;  %v438_v5 = vld [vmem:[%s3245_s16 + $0x8] sm:$0xff]  ;;  %v440_v20 = vld [vmem:[%s3245_s16 + $0x18] sm:$0xff] }
  0x33   : > { %2469 = vmatprep.subr.bf16.mxu1 %v3488_v25  ;;  %v439_v30 = vld [vmem:[%s3245_s16 + $0x10] sm:$0xff]  ;;  %v436_v49 = vld [vmem:[#allocation3] sm:$0xff] }
  0x35   : > { %2439 = vmatpush1.bf16.msra.mxu0 %v3461_v13  ;;  %801 = vperm.xlu0 %3007, %v799_v42  }
  0x36   : > { %2441 = vmatprep.subr.bf16.mxu0 %v3468_v17  ;;  %2471 = vmatpush1.bf16.msra.mxu1 %v3519_v41 }
  0x37   : > { %2473 = vmatprep.subr.bf16.mxu1 %v3523_v43 }
  0x39   : > { %2443 = vmatpush1.bf16.msra.mxu0 %v3506_v36  ;;  %1359 = vperm.xlu0 %3007, %v1357_v56  }
  0x3a   : > { %2445 = vmatprep.subr.bf16.mxu0 %v3510_v37  ;;  %2475 = vmatpush1.bf16.msra.mxu1 %v3543_v55 }
  0x3b   : > { %2477 = vmatprep.subr.bf16.mxu1 %v3547_v58 }
  0x3d   : > { %2447 = vmatpush1.bf16.msra.mxu0 %v3539_v53  ;;  %1731 = vperm.xlu0 %3007, %v1729_v1  }
  0x3e   : > { %2481 = vmatprep.subr.bf16.mxu0 %v3263_v4  ;;  %2479 = vmatpush1.bf16.msra.mxu1 %v3560_v63 }
  0x3f   : > { %2513 = vmatprep.subr.bf16.mxu1 %v3319_v24 }
  0x40   : > { %506 = vmatmul.mubr.f32.vlgmr.msra.gmra.mrb[0].mxu0 %v3557_v62 }
  0x41   : > { %2483 = vmatpush1.bf16.msra.mxu0 %v3276_v9  ;;  %690 = vmatprep.mubr.f32.mxu0 %v3162_v8 }
  0x42   : > { %2485 = vmatprep.subr.bf16.mxu0 %v3278_v10  ;;  %577 = vmatmul.mubr.f32.vlgmr.msra.gmra.mrb[0].mxu1 %v3557_v62 }
  0x43   : > { %2515 = vmatpush1.bf16.msra.mxu1 %v3327_v27  ;;  %761 = vmatprep.mubr.f32.mxu1 %v3162_v8 }
  0x44   : > { %2517 = vmatprep.subr.bf16.mxu1 %v3352_v35 }
  0x45   : > { %2487 = vmatpush1.bf16.msra.mxu0 %v3296_v16 }
  0x46   : > { %2489 = vmatprep.subr.bf16.mxu0 %v3305_v19 }
  0x47   : > { %2519 = vmatpush1.bf16.msra.mxu1 %v3363_v39 }
  0x48   : > { %2521 = vmatprep.subr.bf16.mxu1 %v3387_v47 }
  0x49   : > { %2491 = vmatpush1.bf16.msra.mxu0 %v3330_v28 }
  0x4a   : > { %2493 = vmatprep.subr.bf16.mxu0 %v3343_v32 }
  0x4b   : > { %2523 = vmatpush1.bf16.msra.mxu1 %v3396_v50 }
  0x4c   : > { %2525 = vmatprep.subr.bf16.mxu1 %v3408_v54 }
  0x4d   : > { %2495 = vmatpush1.bf16.msra.mxu0 %v3379_v44 }
  0x4e   : > { %2497 = vmatprep.subr.bf16.mxu0 %v3390_v48 }
  0x4f   : > { %2527 = vmatpush1.bf16.msra.mxu1 %v3439_v0 }
  0x50   : > { %2529 = vmatprep.subr.bf16.mxu1 %v3445_v2 }
  0x51   : > { %2499 = vmatpush1.bf16.msra.mxu0 %v3417_v57 }
  0x52   : > { %2501 = vmatprep.subr.bf16.mxu0 %v3427_v60 }
  0x53   : > { %2531 = vmatpush1.bf16.msra.mxu1 %v3477_v21 }
  0x54   : > { %2533 = vmatprep.subr.bf16.mxu1 %v3488_v25 }
  0x55   : > { %2503 = vmatpush1.bf16.msra.mxu0 %v3461_v13 }
  0x56   : > { %2505 = vmatprep.subr.bf16.mxu0 %v3468_v17 }
  0x57   : > { %2535 = vmatpush1.bf16.msra.mxu1 %v3519_v41 }
  0x58   : > { %2537 = vmatprep.subr.bf16.mxu1 %v3523_v43 }
  0x59   : > { %2507 = vmatpush1.bf16.msra.mxu0 %v3506_v36 }
  0x5a   : > { %2509 = vmatprep.subr.bf16.mxu0 %v3510_v37 }
  0x5b   : > { %2539 = vmatpush1.bf16.msra.mxu1 %v3543_v55 }
  0x5c   : > { %2541 = vmatprep.subr.bf16.mxu1 %v3547_v58 }
  0x5d   : > { %2511 = vmatpush1.bf16.msra.mxu0 %v3539_v53 }
  0x5e   : > { %2545 = vmatprep.subr.bf16.mxu0 %v3263_v4 }
  0x5f   : > { %2543 = vmatpush1.bf16.msra.mxu1 %v3560_v63 }
  0x60   : > { %2577 = vmatprep.subr.bf16.mxu1 %v3319_v24 }
  0xb0   : > { %v616_v56 = vpop.permute.xlu0 %615 }
  0xb1   : > { %vm617_vm4 = vcmp.eq.s32.totalorder %v616_v56, 1  ;;  %v625_v56 = vld [vmem:[%s3245_s16 + $0x38] sm:$0xff] }
 0x113   : > { %v507_v6 = vpop.f32.mrb[0].mxu0 }
 0x114   : > { %v583_v7 = vadd.f32 %v507_v6, %v437_v3  ;;  %v509_v11 = vpop.f32.mrb[1].mxu0 }
 0x115   : > { %v584_v12 = vadd.f32 %v509_v11, %v438_v5  ;;  %v578_v23 = vpop.f32.mrb[0].mxu1 }
 0x116   : > { %v2281_v15 = vmul.f32 -1.442695, %v583_v7  ;;  %v580_v26 = vpop.f32.mrb[1].mxu1  ;;  %v585_v33 = vadd.f32 %v578_v23, %v439_v30  ;;  %v1541_v23 = vstv %s1540_s12 }
 0x117   : > { %v2282_v18 = vmul.f32 -1.442695, %v584_v12  ;;  %v586_v29 = vadd.f32 %v580_v26, %v440_v20  ;;  %vm1542_vm7 = vcmp.lt.s32.totalorder %v1541_v23, %v3482_v22 }
 0x118   : > { %3009 = vpow2.f32 %v2281_v15  ;;  %v1543_v30 = vsel %vm1542_vm7, 1, %v3163_v14 }
 0x119   : > { %3011 = vpow2.f32 %v2282_v18  ;;  %v2283_v31 = vmul.f32 -1.442695, %v586_v29  ;;  %v1169_v18 = vstv %s1168_s10  ;;  %v1913_v29 = vstv %s1912_s13 }
 0x11a   : > { %vm1170_vm6 = vcmp.lt.s32.totalorder %v1169_v18, %v3482_v22  ;;  %vm1914_vm8 = vcmp.lt.s32.totalorder %v1913_v29, %v3482_v22  ;;  %v802_v29 = vpop.permute.xlu0 %801 }
 0x11b   : > { %3013 = vpow2.f32 %v2283_v31  ;;  %v1171_v26 = vsel %vm1170_vm6, 1, %v3163_v14  ;;  %v1915_v31 = vsel %vm1914_vm8, 1, %v3163_v14  ;;  %vm803_vm9 = vcmp.eq.s32.totalorder %v802_v29, 1 }
 0x11c   : > { %3015 = vtanh.f32 %v585_v33  ;;  %v622_v33 = vld [vmem:[%s3245_s16 + $0x20] sm:$0xff] }
 0x122   : > { %v3010_v34 = vpop.eup %3009 }
 0x123   : > { %v3012_v38 = vpop.eup %3011  ;;  %v590_v40 = vadd.f32 1.0, %v3010_v34  ;;  %v623_v34 = vld [vmem:[%s3245_s16 + $0x28] sm:$0xff] }
 0x124   : > { %v596_v42 = vadd.f32 1.0, %v3012_v38 }
 0x125   : > { %3017 = vrcp.f32 %v590_v40  ;;  %v3014_v45 = vpop.eup %3013 }
 0x126   : > { %3019 = vrcp.f32 %v596_v42  ;;  %v3016_v46 = vpop.eup %3015  ;;  %v603_v52 = vadd.f32 1.0, %v3014_v45 }
 0x128   : > { %3021 = vrcp.f32 %v603_v52 }
 0x12f   : > { %v3018_v51 = vpop.eup %3017 }
 0x130   : > { %v3020_v59 = vpop.eup %3019  ;;  %v607_v61 = vmul.f32 %v3018_v51, %v3016_v46 }
 0x131   : > { %v606_v1 = vmul.f32 %v3020_v59, %v436_v49 }
 0x132   : > { %v3022_v6 = vpop.eup %3021 }
 0x133   : > { %v608_v3 = vadd.f32 %v607_v61, %v606_v1 }
 0x135   : > { %3023 = vtanh.f32 %v608_v3  ;;  %v3607_v5 = vsel %vm617_vm4, %v608_v3, %v436_v49 }
 0x13f   : > { %v3024_v7 = vpop.eup %3023 }
 0x140   : > { %v610_v11 = vmul.f32 %v3024_v7, %v3022_v6 }
 0x142   : > { %v3610_v12 = vsel %vm617_vm4, %v610_v11, %v3557_v62  ;;  %v620_v15 = vsel %vm617_vm4, %v610_v11, 0.0  ;;  %v983_v62 = vstv %s982_s22 }
 0x143   : > { %621 = vst [vmem:[%s3250_s20] sm:$0xff] %v620_v15  ;;  %691 = vmatmul.mubr.f32.vlgmr.msra.gmra.mrb[2].mxu0 %v3610_v12  ;;  %762 = vmatmul.mubr.f32.vlgmr.msra.gmra.mrb[2].mxu1 %v3610_v12  ;;  %vm984_vm5 = vcmp.lt.s32.totalorder %v983_v62, %v3482_v22  ;;  %v624_v22 = vld [vmem:[%s3245_s16 + $0x30] sm:$0xff] }
 0x144   : > { %2547 = vmatpush1.bf16.msra.mxu0 %v3276_v9  ;;  %2579 = vmatpush1.bf16.msra.mxu1 %v3327_v27  ;;  %v985_v20 = vsel %vm984_vm5, 1, %v3163_v14 }
 0x145   : > { %2549 = vmatprep.subr.bf16.mxu0 %v3278_v10  ;;  %2581 = vmatprep.subr.bf16.mxu1 %v3352_v35 }
 0x146   : > { %876 = vmatprep.mubr.f32.mxu0 %v3162_v8  ;;  %947 = vmatprep.mubr.f32.mxu1 %v3162_v8 }
 0x147   : > { %987 = vperm.xlu1 %3008, %v985_v20  }
 0x148   : > { %2551 = vmatpush1.bf16.msra.mxu0 %v3296_v16  ;;  %2583 = vmatpush1.bf16.msra.mxu1 %v3363_v39 }
 0x149   : > { %2553 = vmatprep.subr.bf16.mxu0 %v3305_v19  ;;  %2585 = vmatprep.subr.bf16.mxu1 %v3387_v47 }
 0x14b   : > { %1173 = vperm.xlu1 %3008, %v1171_v26  }
 0x14c   : > { %2555 = vmatpush1.bf16.msra.mxu0 %v3330_v28  ;;  %2587 = vmatpush1.bf16.msra.mxu1 %v3396_v50 }
 0x14d   : > { %2557 = vmatprep.subr.bf16.mxu0 %v3343_v32  ;;  %2589 = vmatprep.subr.bf16.mxu1 %v3408_v54 }
 0x14f   : > { %1545 = vperm.xlu1 %3008, %v1543_v30  }
 0x150   : > { %2559 = vmatpush1.bf16.msra.mxu0 %v3379_v44  ;;  %2591 = vmatpush1.bf16.msra.mxu1 %v3439_v0 }
 0x151   : > { %2561 = vmatprep.subr.bf16.mxu0 %v3390_v48  ;;  %2593 = vmatprep.subr.bf16.mxu1 %v3445_v2 }
 0x153   : > { %1917 = vperm.xlu1 %3008, %v1915_v31  }
 0x154   : > { %2563 = vmatpush1.bf16.msra.mxu0 %v3417_v57  ;;  %2595 = vmatpush1.bf16.msra.mxu1 %v3477_v21 }
 0x155   : > { %2565 = vmatprep.subr.bf16.mxu0 %v3427_v60  ;;  %2597 = vmatprep.subr.bf16.mxu1 %v3488_v25 }
 0x158   : > { %2567 = vmatpush1.bf16.msra.mxu0 %v3461_v13  ;;  %2599 = vmatpush1.bf16.msra.mxu1 %v3519_v41 }
 0x159   : > { %2569 = vmatprep.subr.bf16.mxu0 %v3468_v17  ;;  %2601 = vmatprep.subr.bf16.mxu1 %v3523_v43 }
 0x15c   : > { %2571 = vmatpush1.bf16.msra.mxu0 %v3506_v36  ;;  %2603 = vmatpush1.bf16.msra.mxu1 %v3543_v55 }
 0x15d   : > { %2573 = vmatprep.subr.bf16.mxu0 %v3510_v37  ;;  %2605 = vmatprep.subr.bf16.mxu1 %v3547_v58 }
 0x160   : > { %2575 = vmatpush1.bf16.msra.mxu0 %v3539_v53  ;;  %2607 = vmatpush1.bf16.msra.mxu1 %v3560_v63 }
 0x161   : > { %2609 = vmatprep.subr.bf16.mxu0 %v3263_v4  ;;  %2641 = vmatprep.subr.bf16.mxu1 %v3319_v24 }
 0x216   : > { %v692_v38 = vpop.f32.mrb[2].mxu0  ;;  %v763_v40 = vpop.f32.mrb[2].mxu1 }
 0x217   : > { %v768_v42 = vadd.f32 %v692_v38, %v622_v33  ;;  %v694_v45 = vpop.f32.mrb[3].mxu0  ;;  %v765_v46 = vpop.f32.mrb[3].mxu1  ;;  %v770_v1 = vadd.f32 %v763_v40, %v624_v22 }
 0x218   : > { %v769_v49 = vadd.f32 %v694_v45, %v623_v34  ;;  %v771_v59 = vadd.f32 %v765_v46, %v625_v56 }
 0x219   : > { %v2284_v51 = vmul.f32 -1.442695, %v768_v42 }
 0x21a   : > { %v2285_v52 = vmul.f32 -1.442695, %v769_v49  ;;  %v2286_v61 = vmul.f32 -1.442695, %v771_v59 }
 0x21b   : > { %3025 = vpow2.f32 %v2284_v51 }
 0x21c   : > { %3027 = vpow2.f32 %v2285_v52 }
 0x21d   : > { %3029 = vpow2.f32 %v2286_v61  ;;  %v811_v61 = vld [vmem:[%s3245_s16 + $0x58] sm:$0xff] }
 0x21e   : > { %3031 = vtanh.f32 %v770_v1 }
 0x225   : > { %v3026_v14 = vpop.eup %3025 }
 0x226   : > { %v3028_v3 = vpop.eup %3027  ;;  %v775_v6 = vadd.f32 1.0, %v3026_v14  ;;  %v810_v14 = vld [vmem:[%s3245_s16 + $0x50] sm:$0xff] }
 0x227   : > { %v781_v7 = vadd.f32 1.0, %v3028_v3  ;;  %v3030_v11 = vpop.eup %3029 }
 0x228   : > { %3033 = vrcp.f32 %v775_v6  ;;  %v3032_v15 = vpop.eup %3031  ;;  %v788_v23 = vadd.f32 1.0, %v3030_v11 }
 0x229   : > { %3035 = vrcp.f32 %v781_v7 }
 0x22a   : > { %3037 = vrcp.f32 %v788_v23 }
 0x232   : > { %v3034_v62 = vpop.eup %3033 }
 0x233   : > { %v3036_v18 = vpop.eup %3035  ;;  %v792_v20 = vmul.f32 %v3034_v62, %v3032_v15 }
 0x234   : > { %v791_v26 = vmul.f32 %v3036_v18, %v3607_v5  ;;  %v3038_v33 = vpop.eup %3037 }
 0x236   : > { %v793_v30 = vadd.f32 %v792_v20, %v791_v26  ;;  %v988_v26 = vpop.permute.xlu1 %987 }
 0x237   : > { %vm989_vm10 = vcmp.eq.s32.totalorder %v988_v26, 1 }
 0x238   : > { %3039 = vtanh.f32 %v793_v30  ;;  %v3667_v31 = vsel %vm803_vm9, %v793_v30, %v3607_v5  ;;  %v808_v5 = vld [vmem:[%s3245_s16 + $0x40] sm:$0xff] }
 0x242   : > { %v3040_v34 = vpop.eup %3039 }
 0x243   : > { %v795_v38 = vmul.f32 %v3040_v34, %v3038_v33 }
 0x245   : > { %v3670_v40 = vsel %vm803_vm9, %v795_v38, %v3610_v12  ;;  %v806_v42 = vsel %vm803_vm9, %v795_v38, 0.0  ;;  %v809_v12 = vld [vmem:[%s3245_s16 + $0x48] sm:$0xff] }
 0x246   : > { %807 = vst [vmem:[%s3250_s20 + $0x8] sm:$0xff] %v806_v42  ;;  %877 = vmatmul.mubr.f32.vlgmr.msra.gmra.mrb[4].mxu0 %v3670_v40  ;;  %948 = vmatmul.mubr.f32.vlgmr.msra.gmra.mrb[4].mxu1 %v3670_v40 }
 0x247   : > { %2611 = vmatpush1.bf16.msra.mxu0 %v3276_v9  ;;  %2643 = vmatpush1.bf16.msra.mxu1 %v3327_v27 }
 0x248   : > { %2613 = vmatprep.subr.bf16.mxu0 %v3278_v10  ;;  %2645 = vmatprep.subr.bf16.mxu1 %v3352_v35 }
 0x249   : > { %1062 = vmatprep.mubr.f32.mxu0 %v3162_v8  ;;  %1133 = vmatprep.mubr.f32.mxu1 %v3162_v8 }
 0x24b   : > { %2615 = vmatpush1.bf16.msra.mxu0 %v3296_v16  ;;  %2647 = vmatpush1.bf16.msra.mxu1 %v3363_v39 }
 0x24c   : > { %2617 = vmatprep.subr.bf16.mxu0 %v3305_v19  ;;  %2649 = vmatprep.subr.bf16.mxu1 %v3387_v47 }
 0x24f   : > { %2619 = vmatpush1.bf16.msra.mxu0 %v3330_v28  ;;  %2651 = vmatpush1.bf16.msra.mxu1 %v3396_v50 }
 0x250   : > { %2621 = vmatprep.subr.bf16.mxu0 %v3343_v32  ;;  %2653 = vmatprep.subr.bf16.mxu1 %v3408_v54 }
 0x253   : > { %2623 = vmatpush1.bf16.msra.mxu0 %v3379_v44  ;;  %2655 = vmatpush1.bf16.msra.mxu1 %v3439_v0 }
 0x254   : > { %2625 = vmatprep.subr.bf16.mxu0 %v3390_v48  ;;  %2657 = vmatprep.subr.bf16.mxu1 %v3445_v2 }
 0x257   : > { %2627 = vmatpush1.bf16.msra.mxu0 %v3417_v57  ;;  %2659 = vmatpush1.bf16.msra.mxu1 %v3477_v21 }
 0x258   : > { %2629 = vmatprep.subr.bf16.mxu0 %v3427_v60  ;;  %2661 = vmatprep.subr.bf16.mxu1 %v3488_v25 }
 0x25b   : > { %2631 = vmatpush1.bf16.msra.mxu0 %v3461_v13  ;;  %2663 = vmatpush1.bf16.msra.mxu1 %v3519_v41 }
 0x25c   : > { %2633 = vmatprep.subr.bf16.mxu0 %v3468_v17  ;;  %2665 = vmatprep.subr.bf16.mxu1 %v3523_v43 }
 0x25f   : > { %2635 = vmatpush1.bf16.msra.mxu0 %v3506_v36  ;;  %2667 = vmatpush1.bf16.msra.mxu1 %v3543_v55 }
 0x260   : > { %2637 = vmatprep.subr.bf16.mxu0 %v3510_v37  ;;  %2669 = vmatprep.subr.bf16.mxu1 %v3547_v58 }
 0x263   : > { %2639 = vmatpush1.bf16.msra.mxu0 %v3539_v53  ;;  %2671 = vmatpush1.bf16.msra.mxu1 %v3560_v63 }
 0x264   : > { %2673 = vmatprep.subr.bf16.mxu0 %v3263_v4  ;;  %2705 = vmatprep.subr.bf16.mxu1 %v3319_v24 }
 0x319   : > { %v878_v45 = vpop.f32.mrb[4].mxu0  ;;  %v949_v46 = vpop.f32.mrb[4].mxu1 }
 0x31a   : > { %v954_v49 = vadd.f32 %v878_v45, %v808_v5  ;;  %v880_v51 = vpop.f32.mrb[5].mxu0  ;;  %v951_v52 = vpop.f32.mrb[5].mxu1  ;;  %v956_v6 = vadd.f32 %v949_v46, %v810_v14 }
 0x31b   : > { %v955_v56 = vadd.f32 %v880_v51, %v809_v12  ;;  %v957_v1 = vadd.f32 %v951_v52, %v811_v61 }
 0x31c   : > { %v2287_v59 = vmul.f32 -1.442695, %v954_v49 }
 0x31d   : > { %v2288_v22 = vmul.f32 -1.442695, %v955_v56  ;;  %v2289_v3 = vmul.f32 -1.442695, %v957_v1 }
 0x31e   : > { %3041 = vpow2.f32 %v2287_v59 }
 0x31f   : > { %3043 = vpow2.f32 %v2288_v22 }
 0x320   : > { %3045 = vpow2.f32 %v2289_v3  ;;  %v997_v3 = vld [vmem:[%s3245_s16 + $0x78] sm:$0xff] }
 0x321   : > { %3047 = vtanh.f32 %v956_v6 }
 0x328   : > { %v3042_v7 = vpop.eup %3041 }
 0x329   : > { %v3044_v11 = vpop.eup %3043  ;;  %v961_v15 = vadd.f32 1.0, %v3042_v7  ;;  %v996_v7 = vld [vmem:[%s3245_s16 + $0x70] sm:$0xff] }
 0x32a   : > { %v967_v62 = vadd.f32 1.0, %v3044_v11  ;;  %v3046_v18 = vpop.eup %3045 }
 0x32b   : > { %3049 = vrcp.f32 %v961_v15  ;;  %v3048_v20 = vpop.eup %3047  ;;  %v974_v30 = vadd.f32 1.0, %v3046_v18 }
 0x32c   : > { %3051 = vrcp.f32 %v967_v62 }
 0x32d   : > { %3053 = vrcp.f32 %v974_v30 }
 0x335   : > { %v3050_v23 = vpop.eup %3049 }
 0x336   : > { %v3052_v29 = vpop.eup %3051  ;;  %v978_v33 = vmul.f32 %v3050_v23, %v3048_v20 }
 0x337   : > { %v977_v34 = vmul.f32 %v3052_v29, %v3667_v31  ;;  %v3054_v5 = vpop.eup %3053 }
 0x339   : > { %v979_v38 = vadd.f32 %v978_v33, %v977_v34 }
 0x33b   : > { %3055 = vtanh.f32 %v979_v38  ;;  %v3715_v42 = vsel %vm989_vm10, %v979_v38, %v3667_v31  ;;  %v994_v31 = vld [vmem:[%s3245_s16 + $0x60] sm:$0xff] }
 0x345   : > { %v3056_v12 = vpop.eup %3055 }
 0x346   : > { %v981_v45 = vmul.f32 %v3056_v12, %v3054_v5  ;;  %v1174_v12 = vpop.permute.xlu1 %1173 }
 0x347   : > { %vm1175_vm11 = vcmp.eq.s32.totalorder %v1174_v12, 1 }
 0x348   : > { %v3718_v46 = vsel %vm989_vm10, %v981_v45, %v3670_v40  ;;  %v992_v49 = vsel %vm989_vm10, %v981_v45, 0.0  ;;  %v995_v40 = vld [vmem:[%s3245_s16 + $0x68] sm:$0xff] }
 0x349   : > { %993 = vst [vmem:[%s3250_s20 + $0x10] sm:$0xff] %v992_v49  ;;  %1063 = vmatmul.mubr.f32.vlgmr.msra.gmra.mrb[6].mxu0 %v3718_v46  ;;  %1134 = vmatmul.mubr.f32.vlgmr.msra.gmra.mrb[6].mxu1 %v3718_v46 }
 0x34a   : > { %2675 = vmatpush1.bf16.msra.mxu0 %v3276_v9  ;;  %2707 = vmatpush1.bf16.msra.mxu1 %v3327_v27 }
 0x34b   : > { %2677 = vmatprep.subr.bf16.mxu0 %v3278_v10  ;;  %2709 = vmatprep.subr.bf16.mxu1 %v3352_v35 }
 0x34c   : > { %1248 = vmatprep.mubr.f32.mxu0 %v3162_v8  ;;  %1319 = vmatprep.mubr.f32.mxu1 %v3162_v8 }
 0x34e   : > { %2679 = vmatpush1.bf16.msra.mxu0 %v3296_v16  ;;  %2711 = vmatpush1.bf16.msra.mxu1 %v3363_v39 }
 0x34f   : > { %2681 = vmatprep.subr.bf16.mxu0 %v3305_v19  ;;  %2713 = vmatprep.subr.bf16.mxu1 %v3387_v47 }
 0x352   : > { %2683 = vmatpush1.bf16.msra.mxu0 %v3330_v28  ;;  %2715 = vmatpush1.bf16.msra.mxu1 %v3396_v50 }
 0x353   : > { %2685 = vmatprep.subr.bf16.mxu0 %v3343_v32  ;;  %2717 = vmatprep.subr.bf16.mxu1 %v3408_v54 }
 0x356   : > { %2687 = vmatpush1.bf16.msra.mxu0 %v3379_v44  ;;  %2719 = vmatpush1.bf16.msra.mxu1 %v3439_v0 }
 0x357   : > { %2689 = vmatprep.subr.bf16.mxu0 %v3390_v48  ;;  %2721 = vmatprep.subr.bf16.mxu1 %v3445_v2 }
 0x35a   : > { %2691 = vmatpush1.bf16.msra.mxu0 %v3417_v57  ;;  %2723 = vmatpush1.bf16.msra.mxu1 %v3477_v21 }
 0x35b   : > { %2693 = vmatprep.subr.bf16.mxu0 %v3427_v60  ;;  %2725 = vmatprep.subr.bf16.mxu1 %v3488_v25 }
 0x35e   : > { %2695 = vmatpush1.bf16.msra.mxu0 %v3461_v13  ;;  %2727 = vmatpush1.bf16.msra.mxu1 %v3519_v41 }
 0x35f   : > { %2697 = vmatprep.subr.bf16.mxu0 %v3468_v17  ;;  %2729 = vmatprep.subr.bf16.mxu1 %v3523_v43 }
 0x362   : > { %2699 = vmatpush1.bf16.msra.mxu0 %v3506_v36  ;;  %2731 = vmatpush1.bf16.msra.mxu1 %v3543_v55 }
 0x363   : > { %2701 = vmatprep.subr.bf16.mxu0 %v3510_v37  ;;  %2733 = vmatprep.subr.bf16.mxu1 %v3547_v58 }
 0x366   : > { %2703 = vmatpush1.bf16.msra.mxu0 %v3539_v53  ;;  %2735 = vmatpush1.bf16.msra.mxu1 %v3560_v63 }
 0x367   : > { %2737 = vmatprep.subr.bf16.mxu0 %v3263_v4  ;;  %2769 = vmatprep.subr.bf16.mxu1 %v3319_v24 }
 0x41c   : > { %v1064_v51 = vpop.f32.mrb[6].mxu0  ;;  %v1135_v52 = vpop.f32.mrb[6].mxu1 }
 0x41d   : > { %v1140_v56 = vadd.f32 %v1064_v51, %v994_v31  ;;  %v1066_v59 = vpop.f32.mrb[7].mxu0  ;;  %v1137_v22 = vpop.f32.mrb[7].mxu1  ;;  %v1142_v15 = vadd.f32 %v1135_v52, %v996_v7 }
 0x41e   : > { %v1141_v61 = vadd.f32 %v1066_v59, %v995_v40  ;;  %v1143_v6 = vadd.f32 %v1137_v22, %v997_v3 }
 0x41f   : > { %v2290_v1 = vmul.f32 -1.442695, %v1140_v56 }
 0x420   : > { %v2291_v14 = vmul.f32 -1.442695, %v1141_v61  ;;  %v2292_v11 = vmul.f32 -1.442695, %v1143_v6 }
 0x421   : > { %3057 = vpow2.f32 %v2290_v1 }
 0x422   : > { %3059 = vpow2.f32 %v2291_v14 }
 0x423   : > { %3061 = vpow2.f32 %v2292_v11  ;;  %v1183_v11 = vld [vmem:[%s3245_s16 + $0x98] sm:$0xff] }
 0x424   : > { %3063 = vtanh.f32 %v1142_v15 }
 0x42b   : > { %v3058_v62 = vpop.eup %3057 }
 0x42c   : > { %v3060_v18 = vpop.eup %3059  ;;  %v1147_v20 = vadd.f32 1.0, %v3058_v62  ;;  %v1182_v62 = vld [vmem:[%s3245_s16 + $0x90] sm:$0xff] }
 0x42d   : > { %v1153_v23 = vadd.f32 1.0, %v3060_v18  ;;  %v3062_v26 = vpop.eup %3061 }
 0x42e   : > { %3065 = vrcp.f32 %v1147_v20  ;;  %v3064_v29 = vpop.eup %3063  ;;  %v1160_v38 = vadd.f32 1.0, %v3062_v26 }
 0x42f   : > { %3067 = vrcp.f32 %v1153_v23 }
 0x430   : > { %3069 = vrcp.f32 %v1160_v38 }
 0x438   : > { %v3066_v30 = vpop.eup %3065 }
 0x439   : > { %v3068_v33 = vpop.eup %3067  ;;  %v1164_v34 = vmul.f32 %v3066_v30, %v3064_v29 }
 0x43a   : > { %v1163_v5 = vmul.f32 %v3068_v33, %v3715_v42  ;;  %v3070_v31 = vpop.eup %3069 }
 0x43c   : > { %v1165_v45 = vadd.f32 %v1164_v34, %v1163_v5 }
 0x43e   : > { %3071 = vtanh.f32 %v1165_v45  ;;  %v3763_v49 = vsel %vm1175_vm11, %v1165_v45, %v3715_v42  ;;  %v1180_v42 = vld [vmem:[%s3245_s16 + $0x80] sm:$0xff] }
 0x448   : > { %v3072_v40 = vpop.eup %3071 }
 0x449   : > { %v1167_v51 = vmul.f32 %v3072_v40, %v3070_v31  ;;  %v1360_v40 = vpop.permute.xlu0 %1359 }
 0x44a   : > { %vm1361_vm12 = vcmp.eq.s32.totalorder %v1360_v40, 1 }
 0x44b   : > { %v3766_v52 = vsel %vm1175_vm11, %v1167_v51, %v3718_v46  ;;  %v1178_v56 = vsel %vm1175_vm11, %v1167_v51, 0.0  ;;  %v1181_v46 = vld [vmem:[%s3245_s16 + $0x88] sm:$0xff] }
 0x44c   : > { %1179 = vst [vmem:[%s3250_s20 + $0x18] sm:$0xff] %v1178_v56  ;;  %1249 = vmatmul.mubr.f32.vlgmr.msra.gmra.mrb[8].mxu0 %v3766_v52  ;;  %1320 = vmatmul.mubr.f32.vlgmr.msra.gmra.mrb[8].mxu1 %v3766_v52 }
 0x44d   : > { %2739 = vmatpush1.bf16.msra.mxu0 %v3276_v9  ;;  %2771 = vmatpush1.bf16.msra.mxu1 %v3327_v27 }
 0x44e   : > { %2741 = vmatprep.subr.bf16.mxu0 %v3278_v10  ;;  %2773 = vmatprep.subr.bf16.mxu1 %v3352_v35 }
 0x44f   : > { %1434 = vmatprep.mubr.f32.mxu0 %v3162_v8  ;;  %1505 = vmatprep.mubr.f32.mxu1 %v3162_v8 }
 0x451   : > { %2743 = vmatpush1.bf16.msra.mxu0 %v3296_v16  ;;  %2775 = vmatpush1.bf16.msra.mxu1 %v3363_v39 }
 0x452   : > { %2745 = vmatprep.subr.bf16.mxu0 %v3305_v19  ;;  %2777 = vmatprep.subr.bf16.mxu1 %v3387_v47 }
 0x455   : > { %2747 = vmatpush1.bf16.msra.mxu0 %v3330_v28  ;;  %2779 = vmatpush1.bf16.msra.mxu1 %v3396_v50 }
 0x456   : > { %2749 = vmatprep.subr.bf16.mxu0 %v3343_v32  ;;  %2781 = vmatprep.subr.bf16.mxu1 %v3408_v54 }
 0x459   : > { %2751 = vmatpush1.bf16.msra.mxu0 %v3379_v44  ;;  %2783 = vmatpush1.bf16.msra.mxu1 %v3439_v0 }
 0x45a   : > { %2753 = vmatprep.subr.bf16.mxu0 %v3390_v48  ;;  %2785 = vmatprep.subr.bf16.mxu1 %v3445_v2 }
 0x45d   : > { %2755 = vmatpush1.bf16.msra.mxu0 %v3417_v57  ;;  %2787 = vmatpush1.bf16.msra.mxu1 %v3477_v21 }
 0x45e   : > { %2757 = vmatprep.subr.bf16.mxu0 %v3427_v60  ;;  %2789 = vmatprep.subr.bf16.mxu1 %v3488_v25 }
 0x461   : > { %2759 = vmatpush1.bf16.msra.mxu0 %v3461_v13  ;;  %2791 = vmatpush1.bf16.msra.mxu1 %v3519_v41 }
 0x462   : > { %2761 = vmatprep.subr.bf16.mxu0 %v3468_v17  ;;  %2793 = vmatprep.subr.bf16.mxu1 %v3523_v43 }
 0x465   : > { %2763 = vmatpush1.bf16.msra.mxu0 %v3506_v36  ;;  %2795 = vmatpush1.bf16.msra.mxu1 %v3543_v55 }
 0x466   : > { %2765 = vmatprep.subr.bf16.mxu0 %v3510_v37  ;;  %2797 = vmatprep.subr.bf16.mxu1 %v3547_v58 }
 0x469   : > { %2767 = vmatpush1.bf16.msra.mxu0 %v3539_v53  ;;  %2799 = vmatpush1.bf16.msra.mxu1 %v3560_v63 }
 0x46a   : > { %2801 = vmatprep.subr.bf16.mxu0 %v3263_v4  ;;  %2833 = vmatprep.subr.bf16.mxu1 %v3319_v24 }
 0x51f   : > { %v1250_v59 = vpop.f32.mrb[8].mxu0  ;;  %v1321_v22 = vpop.f32.mrb[8].mxu1 }
 0x520   : > { %v1326_v61 = vadd.f32 %v1250_v59, %v1180_v42  ;;  %v1252_v1 = vpop.f32.mrb[9].mxu0  ;;  %v1323_v14 = vpop.f32.mrb[9].mxu1  ;;  %v1328_v20 = vadd.f32 %v1321_v22, %v1182_v62 }
 0x521   : > { %v1327_v3 = vadd.f32 %v1252_v1, %v1181_v46  ;;  %v1329_v15 = vadd.f32 %v1323_v14, %v1183_v11 }
 0x522   : > { %v2293_v6 = vmul.f32 -1.442695, %v1326_v61 }
 0x523   : > { %v2294_v7 = vmul.f32 -1.442695, %v1327_v3  ;;  %v2295_v18 = vmul.f32 -1.442695, %v1329_v15 }
 0x524   : > { %3073 = vpow2.f32 %v2293_v6 }
 0x525   : > { %3075 = vpow2.f32 %v2294_v7 }
 0x526   : > { %3077 = vpow2.f32 %v2295_v18  ;;  %v1369_v18 = vld [vmem:[%s3245_s16 + $0xb8] sm:$0xff] }
 0x527   : > { %3079 = vtanh.f32 %v1328_v20 }
 0x52e   : > { %v3074_v23 = vpop.eup %3073 }
 0x52f   : > { %v3076_v26 = vpop.eup %3075  ;;  %v1333_v29 = vadd.f32 1.0, %v3074_v23  ;;  %v1368_v23 = vld [vmem:[%s3245_s16 + $0xb0] sm:$0xff] }
 0x530   : > { %v1339_v30 = vadd.f32 1.0, %v3076_v26  ;;  %v3078_v33 = vpop.eup %3077 }
 0x531   : > { %3081 = vrcp.f32 %v1333_v29  ;;  %v3080_v34 = vpop.eup %3079  ;;  %v1346_v45 = vadd.f32 1.0, %v3078_v33 }
 0x532   : > { %3083 = vrcp.f32 %v1339_v30 }
 0x533   : > { %3085 = vrcp.f32 %v1346_v45 }
 0x53b   : > { %v3082_v38 = vpop.eup %3081 }
 0x53c   : > { %v3084_v5 = vpop.eup %3083  ;;  %v1350_v12 = vmul.f32 %v3082_v38, %v3080_v34 }
 0x53d   : > { %v1349_v31 = vmul.f32 %v3084_v5, %v3763_v49  ;;  %v3086_v42 = vpop.eup %3085 }
 0x53f   : > { %v1351_v51 = vadd.f32 %v1350_v12, %v1349_v31 }
 0x541   : > { %3087 = vtanh.f32 %v1351_v51  ;;  %v3811_v56 = vsel %vm1361_vm12, %v1351_v51, %v3763_v49  ;;  %v1366_v49 = vld [vmem:[%s3245_s16 + $0xa0] sm:$0xff]  ;;  %v1546_v51 = vpop.permute.xlu1 %1545 }
 0x542   : > { %vm1547_vm13 = vcmp.eq.s32.totalorder %v1546_v51, 1 }
 0x54b   : > { %v3088_v46 = vpop.eup %3087 }
 0x54c   : > { %v1353_v59 = vmul.f32 %v3088_v46, %v3086_v42 }
 0x54e   : > { %v3814_v22 = vsel %vm1361_vm12, %v1353_v59, %v3766_v52  ;;  %v1364_v61 = vsel %vm1361_vm12, %v1353_v59, 0.0  ;;  %v1367_v52 = vld [vmem:[%s3245_s16 + $0xa8] sm:$0xff] }
 0x54f   : > { %1365 = vst [vmem:[%s3250_s20 + $0x20] sm:$0xff] %v1364_v61  ;;  %1435 = vmatmul.mubr.f32.vlgmr.msra.gmra.mrb[10].mxu0 %v3814_v22  ;;  %1506 = vmatmul.mubr.f32.vlgmr.msra.gmra.mrb[10].mxu1 %v3814_v22 }
 0x550   : > { %2803 = vmatpush1.bf16.msra.mxu0 %v3276_v9  ;;  %2835 = vmatpush1.bf16.msra.mxu1 %v3327_v27 }
 0x551   : > { %2805 = vmatprep.subr.bf16.mxu0 %v3278_v10  ;;  %2837 = vmatprep.subr.bf16.mxu1 %v3352_v35 }
 0x552   : > { %1620 = vmatprep.mubr.f32.mxu0 %v3162_v8  ;;  %1691 = vmatprep.mubr.f32.mxu1 %v3162_v8 }
 0x554   : > { %2807 = vmatpush1.bf16.msra.mxu0 %v3296_v16  ;;  %2839 = vmatpush1.bf16.msra.mxu1 %v3363_v39 }
 0x555   : > { %2809 = vmatprep.subr.bf16.mxu0 %v3305_v19  ;;  %2841 = vmatprep.subr.bf16.mxu1 %v3387_v47 }
 0x558   : > { %2811 = vmatpush1.bf16.msra.mxu0 %v3330_v28  ;;  %2843 = vmatpush1.bf16.msra.mxu1 %v3396_v50 }
 0x559   : > { %2813 = vmatprep.subr.bf16.mxu0 %v3343_v32  ;;  %2845 = vmatprep.subr.bf16.mxu1 %v3408_v54 }
 0x55c   : > { %2815 = vmatpush1.bf16.msra.mxu0 %v3379_v44  ;;  %2847 = vmatpush1.bf16.msra.mxu1 %v3439_v0 }
 0x55d   : > { %2817 = vmatprep.subr.bf16.mxu0 %v3390_v48  ;;  %2849 = vmatprep.subr.bf16.mxu1 %v3445_v2 }
 0x560   : > { %2819 = vmatpush1.bf16.msra.mxu0 %v3417_v57  ;;  %2851 = vmatpush1.bf16.msra.mxu1 %v3477_v21 }
 0x561   : > { %2821 = vmatprep.subr.bf16.mxu0 %v3427_v60  ;;  %2853 = vmatprep.subr.bf16.mxu1 %v3488_v25 }
 0x564   : > { %2823 = vmatpush1.bf16.msra.mxu0 %v3461_v13  ;;  %2855 = vmatpush1.bf16.msra.mxu1 %v3519_v41 }
 0x565   : > { %2825 = vmatprep.subr.bf16.mxu0 %v3468_v17  ;;  %2857 = vmatprep.subr.bf16.mxu1 %v3523_v43 }
 0x568   : > { %2827 = vmatpush1.bf16.msra.mxu0 %v3506_v36  ;;  %2859 = vmatpush1.bf16.msra.mxu1 %v3543_v55 }
 0x569   : > { %2829 = vmatprep.subr.bf16.mxu0 %v3510_v37  ;;  %2861 = vmatprep.subr.bf16.mxu1 %v3547_v58 }
 0x56c   : > { %2831 = vmatpush1.bf16.msra.mxu0 %v3539_v53  ;;  %2863 = vmatpush1.bf16.msra.mxu1 %v3560_v63 }
 0x56d   : > { %2865 = vmatprep.subr.bf16.mxu0 %v3263_v4  ;;  %2897 = vmatprep.subr.bf16.mxu1 %v3319_v24 }
 0x622   : > { %v1436_v1 = vpop.f32.mrb[10].mxu0  ;;  %v1507_v14 = vpop.f32.mrb[10].mxu1 }
 0x623   : > { %v1512_v3 = vadd.f32 %v1436_v1, %v1366_v49  ;;  %v1438_v6 = vpop.f32.mrb[11].mxu0  ;;  %v1509_v7 = vpop.f32.mrb[11].mxu1  ;;  %v1514_v4 = vadd.f32 %v1507_v14, %v1368_v23 }
 0x624   : > { %v1513_v11 = vadd.f32 %v1438_v6, %v1367_v52  ;;  %v1515_v20 = vadd.f32 %v1509_v7, %v1369_v18  ;;  %v1739_v6 = vld [vmem:[%s3245_s16 + $0xe8] sm:$0xff] }
 0x625   : > { %v2296_v15 = vmul.f32 -1.442695, %v1512_v3  ;;  %v1738_v3 = vld [vmem:[%s3245_s16 + $0xe0] sm:$0xff] }
 0x626   : > { %v2297_v62 = vmul.f32 -1.442695, %v1513_v11  ;;  %v2298_v26 = vmul.f32 -1.442695, %v1515_v20 }
 0x627   : > { %3089 = vpow2.f32 %v2296_v15 }
 0x628   : > { %3091 = vpow2.f32 %v2297_v62 }
 0x629   : > { %3093 = vpow2.f32 %v2298_v26 }
 0x62a   : > { %3095 = vtanh.f32 %v1514_v4  ;;  %v1741_v4 = vld [vmem:[%s3245_s16 + $0xf8] sm:$0xff] }
 0x631   : > { %v3090_v29 = vpop.eup %3089 }
 0x632   : > { %v3092_v30 = vpop.eup %3091  ;;  %v1519_v24 = vadd.f32 1.0, %v3090_v29 }
 0x633   : > { %v1525_v33 = vadd.f32 1.0, %v3092_v30  ;;  %v3094_v34 = vpop.eup %3093  ;;  %v1740_v30 = vld [vmem:[%s3245_s16 + $0xf0] sm:$0xff] }
 0x634   : > { %3097 = vrcp.f32 %v1519_v24  ;;  %v3096_v38 = vpop.eup %3095  ;;  %v1532_v31 = vadd.f32 1.0, %v3094_v34 }
 0x635   : > { %3099 = vrcp.f32 %v1525_v33 }
 0x636   : > { %3101 = vrcp.f32 %v1532_v31 }
 0x63e   : > { %v3098_v5 = vpop.eup %3097 }
 0x63f   : > { %v3100_v12 = vpop.eup %3099  ;;  %v1536_v45 = vmul.f32 %v3098_v5, %v3096_v38 }
 0x640   : > { %v1535_v40 = vmul.f32 %v3100_v12, %v3811_v56  ;;  %v3102_v59 = vpop.eup %3101 }
 0x642   : > { %v1537_v42 = vadd.f32 %v1536_v45, %v1535_v40 }
 0x644   : > { %3103 = vtanh.f32 %v1537_v42  ;;  %v3859_v46 = vsel %vm1547_vm13, %v1537_v42, %v3811_v56 }
 0x64e   : > { %v3104_v61 = vpop.eup %3103 }
 0x64f   : > { %v1539_v49 = vmul.f32 %v3104_v61, %v3102_v59  ;;  %v1918_v59 = vpop.permute.xlu1 %1917 }
 0x650   : > { %vm1919_vm15 = vcmp.eq.s32.totalorder %v1918_v59, 1 }
 0x651   : > { %v3862_v52 = vsel %vm1547_vm13, %v1539_v49, %v3814_v22  ;;  %v1550_v1 = vsel %vm1547_vm13, %v1539_v49, 0.0 }
 0x652   : > { %1551 = vst [vmem:[%s3250_s20 + $0x28] sm:$0xff] %v1550_v1  ;;  %1621 = vmatmul.mubr.f32.vlgmr.msra.gmra.mrb[12].mxu0 %v3862_v52  ;;  %1692 = vmatmul.mubr.f32.vlgmr.msra.gmra.mrb[12].mxu1 %v3862_v52 }
 0x653   : > { %2867 = vmatpush1.bf16.msra.mxu0 %v3276_v9  ;;  %2899 = vmatpush1.bf16.msra.mxu1 %v3327_v27  ;;  %v1553_v9 = vld [vmem:[%s3245_s16 + $0xc8] sm:$0xff] }
 0x654   : > { %2869 = vmatprep.subr.bf16.mxu0 %v3278_v10  ;;  %2901 = vmatprep.subr.bf16.mxu1 %v3352_v35 }
 0x655   : > { %1806 = vmatprep.mubr.f32.mxu0 %v3162_v8  ;;  %1877 = vmatprep.mubr.f32.mxu1 %v3162_v8  ;;  %v1552_v8 = vld [vmem:[%s3245_s16 + $0xc0] sm:$0xff] }
 0x657   : > { %2871 = vmatpush1.bf16.msra.mxu0 %v3296_v16  ;;  %2903 = vmatpush1.bf16.msra.mxu1 %v3363_v39 }
 0x658   : > { %2873 = vmatprep.subr.bf16.mxu0 %v3305_v19  ;;  %2905 = vmatprep.subr.bf16.mxu1 %v3387_v47 }
 0x65b   : > { %2875 = vmatpush1.bf16.msra.mxu0 %v3330_v28  ;;  %2907 = vmatpush1.bf16.msra.mxu1 %v3396_v50 }
 0x65c   : > { %2877 = vmatprep.subr.bf16.mxu0 %v3343_v32  ;;  %2909 = vmatprep.subr.bf16.mxu1 %v3408_v54 }
 0x65f   : > { %2879 = vmatpush1.bf16.msra.mxu0 %v3379_v44  ;;  %2911 = vmatpush1.bf16.msra.mxu1 %v3439_v0  ;;  %v1555_v44 = vld [vmem:[%s3245_s16 + $0xd8] sm:$0xff] }
 0x660   : > { %2881 = vmatprep.subr.bf16.mxu0 %v3390_v48  ;;  %2913 = vmatprep.subr.bf16.mxu1 %v3445_v2  ;;  %v1554_v48 = vld [vmem:[%s3245_s16 + $0xd0] sm:$0xff] }
 0x663   : > { %2883 = vmatpush1.bf16.msra.mxu0 %v3417_v57  ;;  %2915 = vmatpush1.bf16.msra.mxu1 %v3477_v21 }
 0x664   : > { %2885 = vmatprep.subr.bf16.mxu0 %v3427_v60  ;;  %2917 = vmatprep.subr.bf16.mxu1 %v3488_v25 }
 0x667   : > { %2887 = vmatpush1.bf16.msra.mxu0 %v3461_v13  ;;  %2919 = vmatpush1.bf16.msra.mxu1 %v3519_v41  ;;  %v1732_v41 = vpop.permute.xlu0 %1731 }
 0x668   : > { %2889 = vmatprep.subr.bf16.mxu0 %v3468_v17  ;;  %2921 = vmatprep.subr.bf16.mxu1 %v3523_v43  ;;  %vm1733_vm14 = vcmp.eq.s32.totalorder %v1732_v41, 1 }
 0x66b   : > { %2891 = vmatpush1.bf16.msra.mxu0 %v3506_v36  ;;  %2923 = vmatpush1.bf16.msra.mxu1 %v3543_v55 }
 0x66c   : > { %2893 = vmatprep.subr.bf16.mxu0 %v3510_v37  ;;  %2925 = vmatprep.subr.bf16.mxu1 %v3547_v58 }
 0x66f   : > { %2895 = vmatpush1.bf16.msra.mxu0 %v3539_v53  ;;  %2927 = vmatpush1.bf16.msra.mxu1 %v3560_v63 }
 0x725   : > { %v1622_v10 = vpop.f32.mrb[12].mxu0  ;;  %v1693_v16 = vpop.f32.mrb[12].mxu1 }
 0x726   : > { %v1698_v19 = vadd.f32 %v1622_v10, %v1552_v8  ;;  %v1624_v27 = vpop.f32.mrb[13].mxu0  ;;  %v1695_v28 = vpop.f32.mrb[13].mxu1  ;;  %v1700_v54 = vadd.f32 %v1693_v16, %v1554_v48 }
 0x727   : > { %v1699_v32 = vadd.f32 %v1624_v27, %v1553_v9  ;;  %v1701_v47 = vadd.f32 %v1695_v28, %v1555_v44 }
 0x728   : > { %v2299_v35 = vmul.f32 -1.442695, %v1698_v19 }
 0x729   : > { %v2300_v39 = vmul.f32 -1.442695, %v1699_v32  ;;  %v2301_v50 = vmul.f32 -1.442695, %v1701_v47 }
 0x72a   : > { %3105 = vpow2.f32 %v2299_v35 }
 0x72b   : > { %3107 = vpow2.f32 %v2300_v39 }
 0x72c   : > { %3109 = vpow2.f32 %v2301_v50 }
 0x72d   : > { %3111 = vtanh.f32 %v1700_v54 }
 0x734   : > { %v3106_v57 = vpop.eup %3105 }
 0x735   : > { %v3108_v60 = vpop.eup %3107  ;;  %v1705_v0 = vadd.f32 1.0, %v3106_v57 }
 0x736   : > { %v1711_v2 = vadd.f32 1.0, %v3108_v60  ;;  %v3110_v13 = vpop.eup %3109 }
 0x737   : > { %3113 = vrcp.f32 %v1705_v0  ;;  %v3112_v17 = vpop.eup %3111  ;;  %v1718_v37 = vadd.f32 1.0, %v3110_v13 }
 0x738   : > { %3115 = vrcp.f32 %v1711_v2 }
 0x739   : > { %3117 = vrcp.f32 %v1718_v37 }
 0x741   : > { %v3114_v21 = vpop.eup %3113 }
 0x742   : > { %v3116_v25 = vpop.eup %3115  ;;  %v1722_v36 = vmul.f32 %v3114_v21, %v3112_v17 }
 0x743   : > { %v1721_v43 = vmul.f32 %v3116_v25, %v3859_v46  ;;  %v3118_v58 = vpop.eup %3117 }
 0x745   : > { %v1723_v53 = vadd.f32 %v1722_v36, %v1721_v43 }
 0x747   : > { %3119 = vtanh.f32 %v1723_v53  ;;  %v1735_v55 = vsel %vm1733_vm14, %v1723_v53, %v3859_v46 }
 0x751   : > { %v3120_v63 = vpop.eup %3119 }
 0x752   : > { %v1725_v56 = vmul.f32 %v3120_v63, %v3118_v58 }
 0x754   : > { %v1734_v22 = vsel %vm1733_vm14, %v1725_v56, %v3862_v52  ;;  %v1736_v14 = vsel %vm1733_vm14, %v1725_v56, 0.0 }
 0x755   : > { %1737 = vst [vmem:[%s3250_s20 + $0x30] sm:$0xff] %v1736_v14  ;;  %1807 = vmatmul.mubr.f32.vlgmr.msra.gmra.mrb[14].mxu0 %v1734_v22  ;;  %1878 = vmatmul.mubr.f32.vlgmr.msra.gmra.mrb[14].mxu1 %v1734_v22 }
 0x828   : > { %v1808_v7 = vpop.f32.mrb[14].mxu0  ;;  %v1879_v11 = vpop.f32.mrb[14].mxu1 }
 0x829   : > { %v1884_v15 = vadd.f32 %v1808_v7, %v1738_v3  ;;  %v1810_v62 = vpop.f32.mrb[15].mxu0  ;;  %v1881_v18 = vpop.f32.mrb[15].mxu1  ;;  %v1886_v33 = vadd.f32 %v1879_v11, %v1740_v30 }
 0x82a   : > { %v1885_v20 = vadd.f32 %v1810_v62, %v1739_v6  ;;  %v1887_v29 = vadd.f32 %v1881_v18, %v1741_v4 }
 0x82b   : > { %v2302_v23 = vmul.f32 -1.442695, %v1884_v15 }
 0x82c   : > { %v2303_v26 = vmul.f32 -1.442695, %v1885_v20  ;;  %v2304_v24 = vmul.f32 -1.442695, %v1887_v29 }
 0x82d   : > { %3121 = vpow2.f32 %v2302_v23 }
 0x82e   : > { %3123 = vpow2.f32 %v2303_v26 }
 0x82f   : > { %3125 = vpow2.f32 %v2304_v24 }
 0x830   : > { %3127 = vtanh.f32 %v1886_v33 }
 0x837   : > { %v3122_v34 = vpop.eup %3121 }
 0x838   : > { %v3124_v38 = vpop.eup %3123  ;;  %v1891_v5 = vadd.f32 1.0, %v3122_v34 }
 0x839   : > { %v1897_v12 = vadd.f32 1.0, %v3124_v38  ;;  %v3126_v45 = vpop.eup %3125 }
 0x83a   : > { %3129 = vrcp.f32 %v1891_v5  ;;  %v3128_v31 = vpop.eup %3127  ;;  %v1904_v46 = vadd.f32 1.0, %v3126_v45 }
 0x83b   : > { %3131 = vrcp.f32 %v1897_v12 }
 0x83c   : > { %3133 = vrcp.f32 %v1904_v46 }
 0x844   : > { %v3130_v40 = vpop.eup %3129 }
 0x845   : > { %v3132_v51 = vpop.eup %3131  ;;  %v1908_v42 = vmul.f32 %v3130_v40, %v3128_v31 }
 0x846   : > { %v1907_v61 = vmul.f32 %v3132_v51, %v1735_v55  ;;  %v3134_v1 = vpop.eup %3133 }
 0x848   : > { %v1909_v49 = vadd.f32 %v1908_v42, %v1907_v61 }
 0x84a   : > { %3135 = vtanh.f32 %v1909_v49  ;;  %v1921_v52 = vsel %vm1919_vm15, %v1909_v49, %v1735_v55 }
 0x84b   : > { %1925 = vst [vmem:[#allocation3] sm:$0xff] %v1921_v52 }
 0x854   : > { %v3136_v8 = vpop.eup %3135 }
 0x855   : > { %v1911_v9 = vmul.f32 %v3136_v8, %v3134_v1 }
 0x857   : > { %v1920_v10 = vsel %vm1919_vm15, %v1911_v9, %v1734_v22  ;;  %v1922_v16 = vsel %vm1919_vm15, %v1911_v9, 0.0 }
 0x858   : > { %1923 = vst [vmem:[%s3250_s20 + $0x38] sm:$0xff] %v1922_v16  ;;  %1924 = vst [vmem:[#allocation2] sm:$0xff] %v1920_v10 }
 0x859 PF: > { %s1926_s11 = sld [smem:[#allocation5]] }
 0x85f   : > { %p2305_p8 = scmp.lt.s32.totalorder %s3151_s29, %s1926_s11 }
 0x860   : > { %v3164_v19 = vmov (!%p2305_p8), 0.0  }
 0x861   : > { %1930 = sbr.rel (%p2305_p8) target bundleno = 2152 (0x868), region = 52  ;;  %1931 = vst [vmem:[%s3250_s20] sm:$0xff] (!%p2305_p8), %v3164_v19  ;;  %1932 = vst [vmem:[%s3250_s20 + $0x8] sm:$0xff] (!%p2305_p8), %v3164_v19 }
 0x862   : > { %1933 = vst [vmem:[%s3250_s20 + $0x10] sm:$0xff] (!%p2305_p8), %v3164_v19  ;;  %1934 = vst [vmem:[%s3250_s20 + $0x18] sm:$0xff] (!%p2305_p8), %v3164_v19 }
 0x863   : > { %1935 = vst [vmem:[%s3250_s20 + $0x20] sm:$0xff] (!%p2305_p8), %v3164_v19  ;;  %1936 = vst [vmem:[%s3250_s20 + $0x28] sm:$0xff] (!%p2305_p8), %v3164_v19 }
 0x864   : > { %1937 = vst [vmem:[%s3250_s20 + $0x30] sm:$0xff] (!%p2305_p8), %v3164_v19  ;;  %1938 = vst [vmem:[%s3250_s20 + $0x38] sm:$0xff] (!%p2305_p8), %v3164_v19 }
 0x868 PF: > { %p2306_p9 = scmp.ne.s32.totalorder %s3151_s29, 2 }
 0x869   : > { %v1943_v27 = vld [vmem:[%s3992_s4] sm:$0xff] (!%p2306_p9)  ;;  %v1944_v28 = vld [vmem:[%s3992_s4 + $0x8] sm:$0xff] (!%p2306_p9)  ;;  %v1945_v32 = vld [vmem:[%s3992_s4 + $0x10] sm:$0xff] (!%p2306_p9)  ;;  %v3165_v35 = vmov (!%p2306_p9), 0.0|0.0   ;;  %vm3166_vm0 = vmmov (!%p2306_p9), 0   ;;  %v3167_v47 = vmov (!%p2306_p9), 0.0  }
 0x86a   : > { %1942 = sbr.rel (%p2306_p9) target bundleno = 2402 (0x962), region = 56  ;;  %2928 = vmatprep.subr.bf16.mxu0 (!%p2306_p9), %v3165_v35  ;;  %2952 = vmatprep.subr.bf16.mxu1 (!%p2306_p9), %v3165_v35  ;;  %v2929_v39 = vpack.c.bf16 (!%p2306_p9), %v1944_v28, %v1943_v27  ;;  %v1946_v44 = vld [vmem:[%s3992_s4 + $0x18] sm:$0xff] (!%p2306_p9)  ;;  %v1947_v50 = vld [vmem:[%s3992_s4 + $0x20] sm:$0xff] (!%p2306_p9)  ;;  %v1948_v54 = vld [vmem:[%s3992_s4 + $0x28] sm:$0xff] (!%p2306_p9) }
 0x86b   : > { %2378 = vmatprep.mubr.msk.f32.mxu0 (!%p2306_p9), %vm3166_vm0, %v3167_v47  ;;  %2413 = vmatprep.mubr.msk.f32.mxu1 (!%p2306_p9), %vm3166_vm0, %v3167_v47  ;;  %v2932_v48 = vpack.c.bf16 (!%p2306_p9), %v1946_v44, %v1945_v32  ;;  %v2935_v57 = vpack.c.bf16 (!%p2306_p9), %v1948_v54, %v1947_v50  ;;  %v1949_v60 = vld [vmem:[%s3992_s4 + $0x30] sm:$0xff] (!%p2306_p9)  ;;  %v1950_v0 = vld [vmem:[%s3992_s4 + $0x38] sm:$0xff] (!%p2306_p9)  ;;  %v1951_v13 = vld [vmem:[%s3992_s4 + $0x40] sm:$0xff] (!%p2306_p9) }
 0x86c   : > { %2930 = vmatpush3.bf16.msra.mxu0 (!%p2306_p9), %v2929_v39  ;;  %2954 = vmatpush3.bf16.msra.mxu1 (!%p2306_p9), %v2929_v39  ;;  %v2938_v2 = vpack.c.bf16 (!%p2306_p9), %v1950_v0, %v1949_v60  ;;  %v1952_v17 = vld [vmem:[%s3992_s4 + $0x48] sm:$0xff] (!%p2306_p9)  ;;  %v1953_v25 = vld [vmem:[%s3992_s4 + $0x50] sm:$0xff] (!%p2306_p9)  ;;  %v1954_v36 = vld [vmem:[%s3992_s4 + $0x58] sm:$0xff] (!%p2306_p9) }
 0x86d   : > { %2931 = vmatprep.subr.bf16.mxu0 (!%p2306_p9), %v3165_v35  ;;  %2955 = vmatprep.subr.bf16.mxu1 (!%p2306_p9), %v3165_v35  ;;  %v2941_v21 = vpack.c.bf16 (!%p2306_p9), %v1952_v17, %v1951_v13  ;;  %v2944_v37 = vpack.c.bf16 (!%p2306_p9), %v1954_v36, %v1953_v25  ;;  %v1955_v41 = vld [vmem:[%s3992_s4 + $0x60] sm:$0xff] (!%p2306_p9)  ;;  %v1956_v43 = vld [vmem:[%s3992_s4 + $0x68] sm:$0xff] (!%p2306_p9)  ;;  %v1957_v55 = vld [vmem:[%s3992_s4 + $0x70] sm:$0xff] (!%p2306_p9) }
 0x86e   : > { %v2947_v53 = vpack.c.bf16 (!%p2306_p9), %v1956_v43, %v1955_v41  ;;  %v1958_v58 = vld [vmem:[%s3992_s4 + $0x78] sm:$0xff] (!%p2306_p9)  ;;  %v1960_v56 = vld [vmem:[#allocation2] sm:$0xff] (!%p2306_p9)  ;;  %v2038_v22 = vld [vmem:[#allocation3] sm:$0xff] (!%p2306_p9) }
 0x86f   : > { %v2950_v63 = vpack.c.bf16 (!%p2306_p9), %v1958_v58, %v1957_v55  ;;  %v2307_v14 = vld [vmem:[%s3993_s5] ss:$0 sm:$0xff] (!%p2306_p9) }
 0x870   : > { %2933 = vmatpush3.bf16.msra.mxu0 (!%p2306_p9), %v2932_v48  ;;  %2957 = vmatpush3.bf16.msra.mxu1 (!%p2306_p9), %v2932_v48 }
 0x871   : > { %2934 = vmatprep.subr.bf16.mxu0 %v3165_v35  ;;  %2958 = vmatprep.subr.bf16.mxu1 %v3165_v35 }
 0x874   : > { %2936 = vmatpush3.bf16.msra.mxu0 %v2935_v57  ;;  %2960 = vmatpush3.bf16.msra.mxu1 %v2935_v57 }
 0x875   : > { %2937 = vmatprep.subr.bf16.mxu0 %v3165_v35  ;;  %2961 = vmatprep.subr.bf16.mxu1 %v3165_v35 }
 0x878   : > { %2939 = vmatpush3.bf16.msra.mxu0 %v2938_v2  ;;  %2963 = vmatpush3.bf16.msra.mxu1 %v2938_v2 }
 0x879   : > { %2940 = vmatprep.subr.bf16.mxu0 %v3165_v35  ;;  %2964 = vmatprep.subr.bf16.mxu1 %v3165_v35 }
 0x87c   : > { %2942 = vmatpush3.bf16.msra.mxu0 %v2941_v21  ;;  %2966 = vmatpush3.bf16.msra.mxu1 %v2941_v21 }
 0x87d   : > { %2943 = vmatprep.subr.bf16.mxu0 %v3165_v35  ;;  %2967 = vmatprep.subr.bf16.mxu1 %v3165_v35 }
 0x880   : > { %2945 = vmatpush3.bf16.msra.mxu0 %v2944_v37  ;;  %2969 = vmatpush3.bf16.msra.mxu1 %v2944_v37 }
 0x881   : > { %2946 = vmatprep.subr.bf16.mxu0 %v3165_v35  ;;  %2970 = vmatprep.subr.bf16.mxu1 %v3165_v35 }
 0x884   : > { %2948 = vmatpush3.bf16.msra.mxu0 %v2947_v53  ;;  %2972 = vmatpush3.bf16.msra.mxu1 %v2947_v53 }
 0x885   : > { %2949 = vmatprep.subr.bf16.mxu0 %v3165_v35  ;;  %2973 = vmatprep.subr.bf16.mxu1 %v3165_v35 }
 0x888   : > { %2951 = vmatpush3.bf16.msra.mxu0 %v2950_v63  ;;  %2975 = vmatpush3.bf16.msra.mxu1 %v2950_v63 }
 0x88b   : > { %2379 = vmatmul.mubr.f32.vlgmr.msra.gmra.mrb[0].mxu0 %v1960_v56  ;;  %2414 = vmatmul.mubr.f32.vlgmr.msra.gmra.mrb[0].mxu1 %v2038_v22 }
 0x95e   : > { %v2033_v3 = vpop.f32.mrb[0].mxu0  ;;  %v2105_v6 = vpop.f32.mrb[0].mxu1 }
 0x95f   : > { %v2034_v7 = vadd.f32 %v2307_v14, %v2033_v3  ;;  %v2106_v11 = vadd.f32 %v2307_v14, %v2105_v6  ;;  %v2380_v15 = vpop.f32.mrb[1].mxu0  ;;  %v2415_v62 = vpop.f32.mrb[1].mxu1 }
 0x961   : > { %2037 = vst [vmem:[%s3995_s7] sm:$0xff] %v2034_v7  ;;  %2109 = vst [vmem:[%s3996_s8] sm:$0xff] %v2106_v11 }
 0x962 PF: > { %s20_s9 = sadd.s32 1, %s3159_s9   ;;  %s3997_s29 = smov %s3155_s30 }
 0x963   : > { %p17_p10 = scmp.ge.s32.totalorder %s20_s9, 5   ;;  %s3998_s30 = smov %s4000_s0 }
 0x965   :  { %19 = sbr.rel (!%p17_p10) target bundleno = 2 (0x2), region = 113 }

</bundles_post_ra>
